<compile_context>
chip_gen: v5e
topology: v5e:2x2
jax: 0.10.0
libtpu: 0.0.40
codegen_flags: <defaults>
</compile_context>

<pallas_src>
import functools
import math

import jax
import jax.numpy as jnp
from jax.experimental import pallas as pl
from jax.experimental.pallas import tpu as pltpu


# ---------------------------------------------------------------------------
# helpers
# ---------------------------------------------------------------------------

def _round_up(x, m):
    return ((x + m - 1) // m) * m


def _pick_tm(m_rows, k, n, bytes_per_elem=4, budget_bytes=12 * 1024 * 1024):
    """Row tile TM such that (2x double-buffered x tile + 2x out tile +
    resident weights) stays well under the v5e 16 MiB scoped-VMEM default
    (and therefore also fits v6e's 32 MiB default and v7x's 64 MiB VMEM)."""
    tm = 512
    while tm > 8 and (2 * tm * (k + n) + k * n + n) * bytes_per_elem > budget_bytes:
        tm //= 2
    tm = max(tm, 8)
    return min(tm, _round_up(m_rows, 8))


def _parallel_params():
    return pltpu.CompilerParams(dimension_semantics=("parallel",))


# ---------------------------------------------------------------------------
# fused LayerNorm + Linear (+ optional ReLU):  y = LN(x) @ W + b
# (Annotated-Transformer LN: unbiased std, eps added to std)
# ---------------------------------------------------------------------------

def _ln_linear_kernel(x_ref, g_ref, b_ref, w_ref, bias_ref, o_ref, *, eps, d, apply_relu):
    x = x_ref[...]
    mean = jnp.mean(x, axis=-1, keepdims=True)
    xc = x - mean
    var = jnp.sum(xc * xc, axis=-1, keepdims=True) * (1.0 / (d - 1))
    xn = g_ref[...] * xc / (jnp.sqrt(var) + eps) + b_ref[...]
    y = jnp.dot(xn, w_ref[...], preferred_element_type=jnp.float32) + bias_ref[...]
    if apply_relu:
        y = jnp.maximum(y, 0.0)
    o_ref[...] = y.astype(o_ref.dtype)


def ln_linear(x2d, g, b, w, bias, *, apply_relu=False, eps=1e-6):
    m_rows, k = x2d.shape
    n = w.shape[1]
    tm = _pick_tm(m_rows, k, n)
    m_pad = _round_up(m_rows, tm)
    if m_pad != m_rows:
        x2d = jnp.pad(x2d, ((0, m_pad - m_rows), (0, 0)))
    out = pl.pallas_call(
        functools.partial(_ln_linear_kernel, eps=eps, d=k, apply_relu=apply_relu),
        out_shape=jax.ShapeDtypeStruct((m_pad, n), x2d.dtype),
        grid_spec=pltpu.PrefetchScalarGridSpec(
            num_scalar_prefetch=0,
            grid=(m_pad // tm,),
            in_specs=[
                pl.BlockSpec((tm, k), lambda i: (i, 0)),   # streamed activations
                pl.BlockSpec((1, k), lambda i: (0, 0)),    # LN gamma (resident)
                pl.BlockSpec((1, k), lambda i: (0, 0)),    # LN beta  (resident)
                pl.BlockSpec((k, n), lambda i: (0, 0)),    # weight   (resident)
                pl.BlockSpec((1, n), lambda i: (0, 0)),    # bias     (resident)
            ],
            out_specs=pl.BlockSpec((tm, n), lambda i: (i, 0)),
        ),
        compiler_params=_parallel_params(),
    )(x2d, g.reshape(1, k), b.reshape(1, k), w, bias.reshape(1, n))
    return out[:m_rows]


# ---------------------------------------------------------------------------
# plain Linear (+ optional ReLU, + optional fused residual add)
# ---------------------------------------------------------------------------

def _linear_kernel(x_ref, w_ref, bias_ref, o_ref, *, apply_relu):
    y = jnp.dot(x_ref[...], w_ref[...], preferred_element_type=jnp.float32) + bias_ref[...]
    if apply_relu:
        y = jnp.maximum(y, 0.0)
    o_ref[...] = y.astype(o_ref.dtype)


def _linear_res_kernel(x_ref, w_ref, bias_ref, res_ref, o_ref, *, apply_relu):
    y = jnp.dot(x_ref[...], w_ref[...], preferred_element_type=jnp.float32) + bias_ref[...]
    if apply_relu:
        y = jnp.maximum(y, 0.0)
    o_ref[...] = (y + res_ref[...]).astype(o_ref.dtype)


def linear(x2d, w, bias, *, residual=None, apply_relu=False):
    m_rows, k = x2d.shape
    n = w.shape[1]
    tm = _pick_tm(m_rows, k, n)
    m_pad = _round_up(m_rows, tm)
    if m_pad != m_rows:
        pad = ((0, m_pad - m_rows), (0, 0))
        x2d = jnp.pad(x2d, pad)
        if residual is not None:
            residual = jnp.pad(residual, pad)

    in_specs = [
        pl.BlockSpec((tm, k), lambda i: (i, 0)),   # streamed activations
        pl.BlockSpec((k, n), lambda i: (0, 0)),    # weight (resident)
        pl.BlockSpec((1, n), lambda i: (0, 0)),    # bias   (resident)
    ]
    args = [x2d, w, bias.reshape(1, n)]
    if residual is not None:
        in_specs.append(pl.BlockSpec((tm, n), lambda i: (i, 0)))  # streamed residual
        args.append(residual)
        kernel = functools.partial(_linear_res_kernel, apply_relu=apply_relu)
    else:
        kernel = functools.partial(_linear_kernel, apply_relu=apply_relu)

    out = pl.pallas_call(
        kernel,
        out_shape=jax.ShapeDtypeStruct((m_pad, n), x2d.dtype),
        grid_spec=pltpu.PrefetchScalarGridSpec(
            num_scalar_prefetch=0,
            grid=(m_pad // tm,),
            in_specs=in_specs,
            out_specs=pl.BlockSpec((tm, n), lambda i: (i, 0)),
        ),
        compiler_params=_parallel_params(),
    )(*args)
    return out[:m_rows]


# ---------------------------------------------------------------------------
# multi-head attention core (per-batch program, all heads inside)
# ---------------------------------------------------------------------------

def _mha_core_kernel(q_ref, k_ref, v_ref, mask_ref, o_ref):
    # q_ref: [1, h, Sq, dk]; k_ref/v_ref: [1, h, Sk, dk]; mask_ref: [1, 1, Sk]
    # 1/sqrt(dk) already folded into the query projection.
    q = q_ref[0]
    k = k_ref[0]
    v = v_ref[0]
    mask = mask_ref[0]                                   # [1, Sk]
    s = jnp.einsum("hqd,hkd->hqk", q, k, preferred_element_type=jnp.float32)
    s = jnp.where(mask[None, :, :] > 0.0, s, -1e9)       # broadcast over heads & queries
    s = s - jnp.max(s, axis=-1, keepdims=True)
    p = jnp.exp(s)
    p = p / jnp.sum(p, axis=-1, keepdims=True)
    ctx = jnp.einsum("hqk,hkd->hqd", p, v, preferred_element_type=jnp.float32)
    o_ref[0] = ctx.astype(o_ref.dtype)


def mha_core(q, k, v, mask):
    # q: [B, h, Sq, dk], k/v: [B, h, Sk, dk], mask: [B, 1, Sk] (1 keep / 0 drop)
    bsz, num_heads, sq, dk = q.shape
    sk = k.shape[2]
    return pl.pallas_call(
        _mha_core_kernel,
        out_shape=jax.ShapeDtypeStruct((bsz, num_heads, sq, dk), q.dtype),
        grid_spec=pltpu.PrefetchScalarGridSpec(
            num_scalar_prefetch=0,
            grid=(bsz,),
            in_specs=[
                pl.BlockSpec((1, num_heads, sq, dk), lambda b: (b, 0, 0, 0)),
                pl.BlockSpec((1, num_heads, sk, dk), lambda b: (b, 0, 0, 0)),
                pl.BlockSpec((1, num_heads, sk, dk), lambda b: (b, 0, 0, 0)),
                pl.BlockSpec((1, 1, sk), lambda b: (b, 0, 0)),
            ],
            out_specs=pl.BlockSpec((1, num_heads, sq, dk), lambda b: (b, 0, 0, 0)),
        ),
        compiler_params=_parallel_params(),
    )(q, k, v, mask)


# ---------------------------------------------------------------------------
# final fused kernel: out = ReLU(LN(x) @ W_code + mix @ W_mix + b)
# (= ReLU(cat([LN(x), mix], -1) @ W + b), concat never materialized)
# ---------------------------------------------------------------------------

def _final_kernel(x_ref, g_ref, b_ref, mix_ref, wc_ref, wm_ref, bias_ref, o_ref, *, eps, d):
    x = x_ref[...]
    mean = jnp.mean(x, axis=-1, keepdims=True)
    xc = x - mean
    var = jnp.sum(xc * xc, axis=-1, keepdims=True) * (1.0 / (d - 1))
    code = g_ref[...] * xc / (jnp.sqrt(var) + eps) + b_ref[...]
    y = (jnp.dot(code, wc_ref[...], preferred_element_type=jnp.float32)
         + jnp.dot(mix_ref[...], wm_ref[...], preferred_element_type=jnp.float32)
         + bias_ref[...])
    o_ref[...] = jnp.maximum(y, 0.0).astype(o_ref.dtype)


def final_fc(x2d, mix2d, g, b, wc, wm, bias, *, eps=1e-6):
    m_rows, d = x2d.shape
    n = wc.shape[1]
    tm = _pick_tm(m_rows, 2 * d, n)
    m_pad = _round_up(m_rows, tm)
    if m_pad != m_rows:
        pad = ((0, m_pad - m_rows), (0, 0))
        x2d = jnp.pad(x2d, pad)
        mix2d = jnp.pad(mix2d, pad)
    out = pl.pallas_call(
        functools.partial(_final_kernel, eps=eps, d=d),
        out_shape=jax.ShapeDtypeStruct((m_pad, n), x2d.dtype),
        grid_spec=pltpu.PrefetchScalarGridSpec(
            num_scalar_prefetch=0,
            grid=(m_pad // tm,),
            in_specs=[
                pl.BlockSpec((tm, d), lambda i: (i, 0)),
                pl.BlockSpec((1, d), lambda i: (0, 0)),
                pl.BlockSpec((1, d), lambda i: (0, 0)),
                pl.BlockSpec((tm, d), lambda i: (i, 0)),
                pl.BlockSpec((d, n), lambda i: (0, 0)),
                pl.BlockSpec((d, n), lambda i: (0, 0)),
                pl.BlockSpec((1, n), lambda i: (0, 0)),
            ],
            out_specs=pl.BlockSpec((tm, n), lambda i: (i, 0)),
        ),
        compiler_params=_parallel_params(),
    )(x2d, g.reshape(1, d), b.reshape(1, d), mix2d, wc, wm, bias.reshape(1, n))
    return out[:m_rows]


# ---------------------------------------------------------------------------
# full crossAttention forward (kernel-side, prepared/fused params)
# ---------------------------------------------------------------------------

def cross_attention_forward(params, src_trj, src_vsn, src_mask, obd_enc_mask, *, num_heads):
    bsz, s_trj, d = src_trj.shape
    s_vsn = src_vsn.shape[1]
    assert s_trj == s_vsn, "torch.cat([code, mix], -1) requires equal sequence lengths"
    dk = d // num_heads

    self_mask = obd_enc_mask.astype(jnp.float32)   # [B, 1, S_trj] key-padding mask
    cross_mask = src_mask.astype(jnp.float32)      # [B, 1, S_vsn] key-padding mask

    x2d = src_trj.reshape(bsz * s_trj, d)
    m2d = src_vsn.reshape(bsz * s_vsn, d)

    for layer in params["layers"]:
        # --- self attention sublayer ---
        p = layer["self_attn"]
        qkv = ln_linear(x2d, layer["ln0_g"], layer["ln0_b"], p["w_qkv"], p["b_qkv"])
        qkv = qkv.reshape(bsz, s_trj, 3, num_heads, dk).transpose(2, 0, 3, 1, 4)
        ctx = mha_core(qkv[0], qkv[1], qkv[2], self_mask)        # [B, h, S, dk]
        ctx2d = ctx.transpose(0, 2, 1, 3).reshape(bsz * s_trj, d)
        x2d = linear(ctx2d, p["wo"], p["bo"], residual=x2d)

        # --- cross attention sublayer (memory = src_vsn) ---
        p = layer["src_attn"]
        q = ln_linear(x2d, layer["ln1_g"], layer["ln1_b"], p["wq"], p["bq"])
        q = q.reshape(bsz, s_trj, num_heads, dk).transpose(0, 2, 1, 3)
        kv = linear(m2d, p["w_kv"], p["b_kv"])
        kv = kv.reshape(bsz, s_vsn, 2, num_heads, dk).transpose(2, 0, 3, 1, 4)
        ctx = mha_core(q, kv[0], kv[1], cross_mask)
        ctx2d = ctx.transpose(0, 2, 1, 3).reshape(bsz * s_trj, d)
        x2d = linear(ctx2d, p["wo"], p["bo"], residual=x2d)

        # --- feed-forward sublayer ---
        pf = layer["ff"]
        h1 = ln_linear(x2d, layer["ln2_g"], layer["ln2_b"], pf["w1"], pf["b1"],
                       apply_relu=True)
        x2d = linear(h1, pf["w2"], pf["b2"], residual=x2d)

    out2d = final_fc(x2d, m2d, params["enc_ln_g"], params["enc_ln_b"],
                     params["ws_wc"], params["ws_wm"], params["ws_b"])
    return out2d.reshape(bsz, s_trj, d)


def prepare_params(params_raw, num_heads):
    """Trace-time param fusion: fold 1/sqrt(d_k) into query projections,
    concatenate QKV / KV projection weights, split fc_ws weight."""
    d = params_raw["ws_w"].shape[1]
    scale = 1.0 / math.sqrt(d // num_heads)
    layers = []
    for l in params_raw["layers"]:
        sa, ca = l["self_attn"], l["src_attn"]
        layers.append({
            "ln0_g": l["ln0_g"], "ln0_b": l["ln0_b"],
            "ln1_g": l["ln1_g"], "ln1_b": l["ln1_b"],
            "ln2_g": l["ln2_g"], "ln2_b": l["ln2_b"],
            "self_attn": {
                "w_qkv": jnp.concatenate([sa["wq"] * scale, sa["wk"], sa["wv"]], axis=1),
                "b_qkv": jnp.concatenate([sa["bq"] * scale, sa["bk"], sa["bv"]], axis=0),
                "wo": sa["wo"], "bo": sa["bo"],
            },
            "src_attn": {
                "wq": ca["wq"] * scale, "bq": ca["bq"] * scale,
                "w_kv": jnp.concatenate([ca["wk"], ca["wv"]], axis=1),
                "b_kv": jnp.concatenate([ca["bk"], ca["bv"]], axis=0),
                "wo": ca["wo"], "bo": ca["bo"],
            },
            "ff": l["ff"],
        })
    return {
        "layers": layers,
        "enc_ln_g": params_raw["enc_ln_g"], "enc_ln_b": params_raw["enc_ln_b"],
        "ws_wc": params_raw["ws_w"][:d], "ws_wm": params_raw["ws_w"][d:],
        "ws_b": params_raw["ws_b"],
    }


# ---------------------------------------------------------------------------
# pure-JAX reference (un-fused params, explicit 1/sqrt(dk))
# ---------------------------------------------------------------------------

def reference_forward(params, src_trj, src_vsn, src_mask, obd_enc_mask, *, num_heads):
    hp = "highest"

    def ln(x, g, b, eps=1e-6):
        mean = jnp.mean(x, axis=-1, keepdims=True)
        xc = x - mean
        var = jnp.sum(xc * xc, axis=-1, keepdims=True) / (x.shape[-1] - 1)
        return g * xc / (jnp.sqrt(var) + eps) + b

    def lin(x, w, b, relu=False):
        y = jnp.matmul(x, w, precision=hp) + b
        return jnp.maximum(y, 0.0) if relu else y

    def mha(p, query, key, value, mask):
        bsz, sq, d_model = query.shape
        sk = key.shape[1]
        dk = d_model // num_heads
        q = lin(query, p["wq"], p["bq"]).reshape(bsz, sq, num_heads, dk).transpose(0, 2, 1, 3)
        k = lin(key, p["wk"], p["bk"]).reshape(bsz, sk, num_heads, dk).transpose(0, 2, 1, 3)
        v = lin(value, p["wv"], p["bv"]).reshape(bsz, sk, num_heads, dk).transpose(0, 2, 1, 3)
        s = jnp.einsum("bhqd,bhkd->bhqk", q, k, precision=hp) / math.sqrt(dk)
        s = jnp.where(mask[:, None, :, :] > 0.0, s, -1e9)      # [B,1,1,Sk] broadcast
        a = jax.nn.softmax(s, axis=-1)
        ctx = jnp.einsum("bhqk,bhkd->bhqd", a, v, precision=hp)
        ctx = ctx.transpose(0, 2, 1, 3).reshape(bsz, sq, d_model)
        return lin(ctx, p["wo"], p["bo"])

    x, m = src_trj, src_vsn
    self_mask = obd_enc_mask.astype(jnp.float32)
    cross_mask = src_mask.astype(jnp.float32)
    for layer in params["layers"]:
        xn = ln(x, layer["ln0_g"], layer["ln0_b"])
        x = x + mha(layer["self_attn"], xn, xn, xn, self_mask)
        xn = ln(x, layer["ln1_g"], layer["ln1_b"])
        x = x + mha(layer["src_attn"], xn, m, m, cross_mask)
        xn = ln(x, layer["ln2_g"], layer["ln2_b"])
        x = x + lin(lin(xn, layer["ff"]["w1"], layer["ff"]["b1"], relu=True),
                    layer["ff"]["w2"], layer["ff"]["b2"])
    code = ln(x, params["enc_ln_g"], params["enc_ln_b"])
    cat = jnp.concatenate([code, m], axis=-1)
    return lin(cat, params["ws_w"], params["ws_b"], relu=True)


# ---------------------------------------------------------------------------
# main
# ---------------------------------------------------------------------------

if __name__ == "__main__":
    # Small shapes consistent with the module (d_model a multiple of 128 so all
    # linear outputs are lane-dense).
    num_layers = 1
    d_model = 128
    d_ff = 256
    num_heads = 4
    bsz, s_trj, s_vsn = 2, 8, 8

    key = jax.random.PRNGKey(0)
    keys = jax.random.split(key, 16)

    def init_linear(k, fan_in, fan_out):
        kw, kb = jax.random.split(k)
        bound = 1.0 / math.sqrt(fan_in)
        w = jax.random.uniform(kw, (fan_in, fan_out), jnp.float32, -bound, bound)
        b = jax.random.uniform(kb, (fan_out,), jnp.float32, -bound, bound)
        return w, b

    def init_attn(k):
        ks = jax.random.split(k, 4)
        p = {}
        for name, kk in zip(("q", "k", "v", "o"), ks):
            w, b_ = init_linear(kk, d_model, d_model)
            p["w" + name] = w
            p["b" + name] = b_
        return p

    w1, b1 = init_linear(keys[2], d_model, d_ff)
    w2, b2 = init_linear(keys[3], d_ff, d_model)
    layer = {
        "self_attn": init_attn(keys[0]),
        "src_attn": init_attn(keys[1]),
        "ff": {"w1": w1, "b1": b1, "w2": w2, "b2": b2},
        "ln0_g": jnp.ones((d_model,), jnp.float32), "ln0_b": jnp.zeros((d_model,), jnp.float32),
        "ln1_g": jnp.ones((d_model,), jnp.float32), "ln1_b": jnp.zeros((d_model,), jnp.float32),
        "ln2_g": jnp.ones((d_model,), jnp.float32), "ln2_b": jnp.zeros((d_model,), jnp.float32),
    }
    ws_w, ws_b = init_linear(keys[4], 2 * d_model, d_model)
    params_raw = {
        "layers": [layer] * num_layers,
        "enc_ln_g": jnp.ones((d_model,), jnp.float32),
        "enc_ln_b": jnp.zeros((d_model,), jnp.float32),
        "ws_w": ws_w,
        "ws_b": ws_b,
    }

    params_kernel = prepare_params(params_raw, num_heads)

    kx1, kx2 = jax.random.split(keys[5])
    src_trj = jax.random.normal(kx1, (bsz, s_trj, d_model), jnp.float32)
    src_vsn = jax.random.normal(kx2, (bsz, s_vsn, d_model), jnp.float32)
    # key-padding masks (1 = keep, 0 = masked), shaped [B, 1, S] as in the module
    src_mask = jnp.ones((bsz, 1, s_vsn), jnp.float32).at[1, 0, s_vsn - 2:].set(0.0)
    obd_enc_mask = jnp.ones((bsz, 1, s_trj), jnp.float32).at[0, 0, s_trj - 1:].set(0.0)

    fwd = jax.jit(functools.partial(cross_attention_forward, num_heads=num_heads))
    out = jax.block_until_ready(fwd(params_kernel, src_trj, src_vsn, src_mask, obd_enc_mask))

    ref = jax.block_until_ready(
        reference_forward(params_raw, src_trj, src_vsn, src_mask, obd_enc_mask,
                          num_heads=num_heads))

    assert out.shape == (bsz, s_trj, d_model)
    assert jnp.allclose(out, ref, atol=3e-3, rtol=3e-3), \
        f"max abs err {float(jnp.max(jnp.abs(out - ref)))}"

    print("KERNEL_OK")
</pallas_src>

<mosaic_0001>
module attributes {stable_mosaic.version = 11 : i64} {
  func.func @_ln_linear_kernel(%arg0: i32, %arg1: memref<16x128xf32, #tpu.memory_space<vmem>>, %arg2: memref<1x128xf32, #tpu.memory_space<vmem>>, %arg3: memref<1x128xf32, #tpu.memory_space<vmem>>, %arg4: memref<128x384xf32, #tpu.memory_space<vmem>>, %arg5: memref<1x384xf32, #tpu.memory_space<vmem>>, %arg6: memref<16x384xf32, #tpu.memory_space<vmem>>) attributes {dimension_semantics = [#tpu.dimension_semantics<parallel>], iteration_bounds = array<i64: 1>, scalar_prefetch = 0 : i64, scratch_operands = 0 : i64, tpu.core_type = #tpu.core_type<tc>, window_params = [{transform_indices = @transform_0, window_bounds = array<i64: 16, 128>}, {pipeline_mode = #tpu.pipeline_mode<synchronous>, transform_indices = @transform_1, window_bounds = array<i64: 1, 128>}, {pipeline_mode = #tpu.pipeline_mode<synchronous>, transform_indices = @transform_2, window_bounds = array<i64: 1, 128>}, {pipeline_mode = #tpu.pipeline_mode<synchronous>, transform_indices = @transform_3, window_bounds = array<i64: 128, 384>}, {pipeline_mode = #tpu.pipeline_mode<synchronous>, transform_indices = @transform_4, window_bounds = array<i64: 1, 384>}, {transform_indices = @transform_5, window_bounds = array<i64: 16, 384>}]} {
    %c0 = arith.constant 0 : index
    %c0_0 = arith.constant 0 : index
    %0 = vector.load %arg1[%c0, %c0_0] : memref<16x128xf32, #tpu.memory_space<vmem>>, vector<16x128xf32>
    %cst = arith.constant dense<0.000000e+00> : vector<16xf32>
    %1 = vector.multi_reduction <add>, %0, %cst [1] : vector<16x128xf32> to vector<16xf32>
    %2 = vector.shape_cast %1 : vector<16xf32> to vector<16x1xf32>
    %cst_1 = arith.constant 1.280000e+02 : f32
    %3 = vector.broadcast %cst_1 : f32 to vector<16x1xf32>
    %4 = arith.divf %2, %3 : vector<16x1xf32>
    %5 = vector.broadcast %4 : vector<16x1xf32> to vector<16x128xf32>
    %6 = arith.subf %0, %5 : vector<16x128xf32>
    %7 = arith.mulf %6, %6 : vector<16x128xf32>
    %cst_2 = arith.constant dense<0.000000e+00> : vector<16xf32>
    %8 = vector.multi_reduction <add>, %7, %cst_2 [1] : vector<16x128xf32> to vector<16xf32>
    %9 = vector.shape_cast %8 : vector<16xf32> to vector<16x1xf32>
    %cst_3 = arith.constant 0.00787401571 : f32
    %10 = vector.broadcast %cst_3 : f32 to vector<16x1xf32>
    %11 = arith.mulf %9, %10 : vector<16x1xf32>
    %c0_4 = arith.constant 0 : index
    %c0_5 = arith.constant 0 : index
    %12 = vector.load %arg2[%c0_4, %c0_5] : memref<1x128xf32, #tpu.memory_space<vmem>>, vector<1x128xf32>
    %13 = vector.broadcast %12 : vector<1x128xf32> to vector<16x128xf32>
    %14 = arith.mulf %13, %6 : vector<16x128xf32>
    %15 = math.sqrt %11 : vector<16x1xf32>
    %cst_6 = arith.constant 9.99999997E-7 : f32
    %16 = vector.broadcast %cst_6 : f32 to vector<16x1xf32>
    %17 = arith.addf %15, %16 : vector<16x1xf32>
    %18 = vector.broadcast %17 : vector<16x1xf32> to vector<16x128xf32>
    %19 = arith.divf %14, %18 : vector<16x128xf32>
    %c0_7 = arith.constant 0 : index
    %c0_8 = arith.constant 0 : index
    %20 = vector.load %arg3[%c0_7, %c0_8] : memref<1x128xf32, #tpu.memory_space<vmem>>, vector<1x128xf32>
    %21 = vector.broadcast %20 : vector<1x128xf32> to vector<16x128xf32>
    %22 = arith.addf %19, %21 : vector<16x128xf32>
    %c0_9 = arith.constant 0 : index
    %c0_10 = arith.constant 0 : index
    %23 = vector.load %arg4[%c0_9, %c0_10] : memref<128x384xf32, #tpu.memory_space<vmem>>, vector<128x384xf32>
    %cst_11 = arith.constant dense<0.000000e+00> : vector<16x384xf32>
    %24 = tpu.matmul %22, %23, %cst_11 {dimension_numbers = #tpu.dot_dimension_numbers<[1], [0], [0], [1], [0, 0, 1, 1], [], []>} : vector<16x128xf32>, vector<128x384xf32>, vector<16x384xf32> -> vector<16x384xf32>
    %c0_12 = arith.constant 0 : index
    %c0_13 = arith.constant 0 : index
    %25 = vector.load %arg5[%c0_12, %c0_13] : memref<1x384xf32, #tpu.memory_space<vmem>>, vector<1x384xf32>
    %26 = vector.broadcast %25 : vector<1x384xf32> to vector<16x384xf32>
    %27 = arith.addf %24, %26 : vector<16x384xf32>
    %c0_14 = arith.constant 0 : index
    %c0_15 = arith.constant 0 : index
    %28 = vector.load %arg6[%c0_14, %c0_15] : memref<16x384xf32, #tpu.memory_space<vmem>>, vector<16x384xf32>
    tpu.vector_store %arg6[%c0_14, %c0_15], %27 {strides = array<i32>} : memref<16x384xf32, #tpu.memory_space<vmem>>, vector<16x384xf32>,
    return
  }
  func.func @transform_0(%arg0: i32) -> (i32, i32) {
    %c0_i32 = arith.constant 0 : i32
    %c0_i32_0 = arith.constant 0 : i32
    return %arg0, %c0_i32 : i32, i32
  }
  func.func @transform_1(%arg0: i32) -> (i32, i32) {
    %c0_i32 = arith.constant 0 : i32
    %c0_i32_0 = arith.constant 0 : i32
    %c0_i32_1 = arith.constant 0 : i32
    return %c0_i32, %c0_i32_0 : i32, i32
  }
  func.func @transform_2(%arg0: i32) -> (i32, i32) {
    %c0_i32 = arith.constant 0 : i32
    %c0_i32_0 = arith.constant 0 : i32
    %c0_i32_1 = arith.constant 0 : i32
    return %c0_i32, %c0_i32_0 : i32, i32
  }
  func.func @transform_3(%arg0: i32) -> (i32, i32) {
    %c0_i32 = arith.constant 0 : i32
    %c0_i32_0 = arith.constant 0 : i32
    %c0_i32_1 = arith.constant 0 : i32
    return %c0_i32, %c0_i32_0 : i32, i32
  }
  func.func @transform_4(%arg0: i32) -> (i32, i32) {
    %c0_i32 = arith.constant 0 : i32
    %c0_i32_0 = arith.constant 0 : i32
    %c0_i32_1 = arith.constant 0 : i32
    return %c0_i32, %c0_i32_0 : i32, i32
  }
  func.func @transform_5(%arg0: i32) -> (i32, i32) {
    %c0_i32 = arith.constant 0 : i32
    %c0_i32_0 = arith.constant 0 : i32
    return %arg0, %c0_i32 : i32, i32
  }
}

module attributes {stable_mosaic.version = 11 : i64} {
  func.func @_mha_core_kernel(%arg0: i32, %arg1: memref<1x4x8x32xf32, #tpu.memory_space<vmem>>, %arg2: memref<1x4x8x32xf32, #tpu.memory_space<vmem>>, %arg3: memref<1x4x8x32xf32, #tpu.memory_space<vmem>>, %arg4: memref<1x1x8xf32, #tpu.memory_space<vmem>>, %arg5: memref<1x4x8x32xf32, #tpu.memory_space<vmem>>) attributes {dimension_semantics = [#tpu.dimension_semantics<parallel>], iteration_bounds = array<i64: 2>, scalar_prefetch = 0 : i64, scratch_operands = 0 : i64, tpu.core_type = #tpu.core_type<tc>, window_params = [{transform_indices = @transform_0, window_bounds = array<i64: 1, 4, 8, 32>}, {transform_indices = @transform_1, window_bounds = array<i64: 1, 4, 8, 32>}, {transform_indices = @transform_2, window_bounds = array<i64: 1, 4, 8, 32>}, {transform_indices = @transform_3, window_bounds = array<i64: 1, 1, 8>}, {transform_indices = @transform_4, window_bounds = array<i64: 1, 4, 8, 32>}]} {
    %c0 = arith.constant 0 : index
    %c0_0 = arith.constant 0 : index
    %c0_1 = arith.constant 0 : index
    %c0_2 = arith.constant 0 : index
    %0 = vector.load %arg1[%c0, %c0_0, %c0_1, %c0_2] : memref<1x4x8x32xf32, #tpu.memory_space<vmem>>, vector<1x4x8x32xf32>
    %1 = vector.shape_cast %0 : vector<1x4x8x32xf32> to vector<4x8x32xf32>
    %c0_3 = arith.constant 0 : index
    %c0_4 = arith.constant 0 : index
    %c0_5 = arith.constant 0 : index
    %c0_6 = arith.constant 0 : index
    %2 = vector.load %arg2[%c0_3, %c0_4, %c0_5, %c0_6] : memref<1x4x8x32xf32, #tpu.memory_space<vmem>>, vector<1x4x8x32xf32>
    %3 = vector.shape_cast %2 : vector<1x4x8x32xf32> to vector<4x8x32xf32>
    %c0_7 = arith.constant 0 : index
    %c0_8 = arith.constant 0 : index
    %c0_9 = arith.constant 0 : index
    %c0_10 = arith.constant 0 : index
    %4 = vector.load %arg3[%c0_7, %c0_8, %c0_9, %c0_10] : memref<1x4x8x32xf32, #tpu.memory_space<vmem>>, vector<1x4x8x32xf32>
    %5 = vector.shape_cast %4 : vector<1x4x8x32xf32> to vector<4x8x32xf32>
    %c0_11 = arith.constant 0 : index
    %c0_12 = arith.constant 0 : index
    %c0_13 = arith.constant 0 : index
    %6 = vector.load %arg4[%c0_11, %c0_12, %c0_13] : memref<1x1x8xf32, #tpu.memory_space<vmem>>, vector<1x1x8xf32>
    %7 = vector.shape_cast %6 : vector<1x1x8xf32> to vector<1x8xf32>
    "tpu.trace_start"() <{level = 10 : i32, message = "hqd,hkd->hqk"}> : () -> ()
    %cst = arith.constant dense<0.000000e+00> : vector<4x8x8xf32>
    %8 = tpu.matmul %1, %3, %cst {dimension_numbers = #tpu.dot_dimension_numbers<[2], [2], [1], [1], [0, 0, 0, 1, 1, 1], [0], [0]>} : vector<4x8x32xf32>, vector<4x8x32xf32>, vector<4x8x8xf32> -> vector<4x8x8xf32>
    "tpu.trace_stop"() : () -> ()
    %9 = vector.shape_cast %7 : vector<1x8xf32> to vector<1x1x8xf32>
    %cst_14 = arith.constant 0.000000e+00 : f32
    %10 = vector.broadcast %cst_14 : f32 to vector<1x1x8xf32>
    %11 = arith.cmpf ogt, %9, %10 : vector<1x1x8xf32>
    %cst_15 = arith.constant -1.000000e+09 : f32
    %12 = vector.shape_cast %11 : vector<1x1x8xi1> to vector<1x1x8xi1>
    %13 = vector.broadcast %12 : vector<1x1x8xi1> to vector<4x8x8xi1>
    %14 = vector.broadcast %cst_15 : f32 to vector<4x8x8xf32>
    %15 = arith.select %13, %8, %14 : vector<4x8x8xi1>, vector<4x8x8xf32>
    %cst_16 = arith.constant dense<0xFF800000> : vector<4x8xf32>
    %16 = vector.multi_reduction <maximumf>, %15, %cst_16 [2] : vector<4x8x8xf32> to vector<4x8xf32>
    %17 = vector.shape_cast %16 : vector<4x8xf32> to vector<4x8x1xf32>
    %18 = vector.broadcast %17 : vector<4x8x1xf32> to vector<4x8x8xf32>
    %19 = arith.subf %15, %18 : vector<4x8x8xf32>
    %20 = math.exp %19 : vector<4x8x8xf32>
    %cst_17 = arith.constant dense<0.000000e+00> : vector<4x8xf32>
    %21 = vector.multi_reduction <add>, %20, %cst_17 [2] : vector<4x8x8xf32> to vector<4x8xf32>
    %22 = vector.shape_cast %21 : vector<4x8xf32> to vector<4x8x1xf32>
    %23 = vector.broadcast %22 : vector<4x8x1xf32> to vector<4x8x8xf32>
    %24 = arith.divf %20, %23 : vector<4x8x8xf32>
    "tpu.trace_start"() <{level = 10 : i32, message = "hqk,hkd->hqd"}> : () -> ()
    %cst_18 = arith.constant dense<0.000000e+00> : vector<4x8x32xf32>
    %25 = tpu.matmul %24, %5, %cst_18 {dimension_numbers = #tpu.dot_dimension_numbers<[2], [1], [1], [2], [0, 0, 0, 1, 1, 2], [0], [0]>} : vector<4x8x8xf32>, vector<4x8x32xf32>, vector<4x8x32xf32> -> vector<4x8x32xf32>
    "tpu.trace_stop"() : () -> ()
    %c0_19 = arith.constant 0 : index
    %c0_20 = arith.constant 0 : index
    %c0_21 = arith.constant 0 : index
    %c0_22 = arith.constant 0 : index
    %26 = vector.load %arg5[%c0_19, %c0_20, %c0_21, %c0_22] : memref<1x4x8x32xf32, #tpu.memory_space<vmem>>, vector<1x4x8x32xf32>
    %27 = vector.shape_cast %26 : vector<1x4x8x32xf32> to vector<4x8x32xf32>
    %28 = vector.shape_cast %25 : vector<4x8x32xf32> to vector<1x4x8x32xf32>
    tpu.vector_store %arg5[%c0_19, %c0_20, %c0_21, %c0_22], %28 {strides = array<i32>} : memref<1x4x8x32xf32, #tpu.memory_space<vmem>>, vector<1x4x8x32xf32>,
    return
  }
  func.func @transform_0(%arg0: i32) -> (i32, i32, i32, i32) {
    %c0_i32 = arith.constant 0 : i32
    %c0_i32_0 = arith.constant 0 : i32
    %c0_i32_1 = arith.constant 0 : i32
    %c0_i32_2 = arith.constant 0 : i32
    return %arg0, %c0_i32, %c0_i32_0, %c0_i32_1 : i32, i32, i32, i32
  }
  func.func @transform_1(%arg0: i32) -> (i32, i32, i32, i32) {
    %c0_i32 = arith.constant 0 : i32
    %c0_i32_0 = arith.constant 0 : i32
    %c0_i32_1 = arith.constant 0 : i32
    %c0_i32_2 = arith.constant 0 : i32
    return %arg0, %c0_i32, %c0_i32_0, %c0_i32_1 : i32, i32, i32, i32
  }
  func.func @transform_2(%arg0: i32) -> (i32, i32, i32, i32) {
    %c0_i32 = arith.constant 0 : i32
    %c0_i32_0 = arith.constant 0 : i32
    %c0_i32_1 = arith.constant 0 : i32
    %c0_i32_2 = arith.constant 0 : i32
    return %arg0, %c0_i32, %c0_i32_0, %c0_i32_1 : i32, i32, i32, i32
  }
  func.func @transform_3(%arg0: i32) -> (i32, i32, i32) {
    %c0_i32 = arith.constant 0 : i32
    %c0_i32_0 = arith.constant 0 : i32
    %c0_i32_1 = arith.constant 0 : i32
    return %arg0, %c0_i32, %c0_i32_0 : i32, i32, i32
  }
  func.func @transform_4(%arg0: i32) -> (i32, i32, i32, i32) {
    %c0_i32 = arith.constant 0 : i32
    %c0_i32_0 = arith.constant 0 : i32
    %c0_i32_1 = arith.constant 0 : i32
    %c0_i32_2 = arith.constant 0 : i32
    return %arg0, %c0_i32, %c0_i32_0, %c0_i32_1 : i32, i32, i32, i32
  }
}

module attributes {stable_mosaic.version = 11 : i64} {
  func.func @_linear_res_kernel(%arg0: i32, %arg1: memref<16x128xf32, #tpu.memory_space<vmem>>, %arg2: memref<128x128xf32, #tpu.memory_space<vmem>>, %arg3: memref<1x128xf32, #tpu.memory_space<vmem>>, %arg4: memref<16x128xf32, #tpu.memory_space<vmem>>, %arg5: memref<16x128xf32, #tpu.memory_space<vmem>>) attributes {dimension_semantics = [#tpu.dimension_semantics<parallel>], iteration_bounds = array<i64: 1>, scalar_prefetch = 0 : i64, scratch_operands = 0 : i64, tpu.core_type = #tpu.core_type<tc>, window_params = [{transform_indices = @transform_0, window_bounds = array<i64: 16, 128>}, {pipeline_mode = #tpu.pipeline_mode<synchronous>, transform_indices = @transform_1, window_bounds = array<i64: 128, 128>}, {pipeline_mode = #tpu.pipeline_mode<synchronous>, transform_indices = @transform_2, window_bounds = array<i64: 1, 128>}, {transform_indices = @transform_3, window_bounds = array<i64: 16, 128>}, {transform_indices = @transform_4, window_bounds = array<i64: 16, 128>}]} {
    %c0 = arith.constant 0 : index
    %c0_0 = arith.constant 0 : index
    %0 = vector.load %arg1[%c0, %c0_0] : memref<16x128xf32, #tpu.memory_space<vmem>>, vector<16x128xf32>
    %c0_1 = arith.constant 0 : index
    %c0_2 = arith.constant 0 : index
    %1 = vector.load %arg2[%c0_1, %c0_2] : memref<128x128xf32, #tpu.memory_space<vmem>>, vector<128x128xf32>
    %cst = arith.constant dense<0.000000e+00> : vector<16x128xf32>
    %2 = tpu.matmul %0, %1, %cst {dimension_numbers = #tpu.dot_dimension_numbers<[1], [0], [0], [1], [0, 0, 1, 1], [], []>} : vector<16x128xf32>, vector<128x128xf32>, vector<16x128xf32> -> vector<16x128xf32>
    %c0_3 = arith.constant 0 : index
    %c0_4 = arith.constant 0 : index
    %3 = vector.load %arg3[%c0_3, %c0_4] : memref<1x128xf32, #tpu.memory_space<vmem>>, vector<1x128xf32>
    %4 = vector.broadcast %3 : vector<1x128xf32> to vector<16x128xf32>
    %5 = arith.addf %2, %4 : vector<16x128xf32>
    %c0_5 = arith.constant 0 : index
    %c0_6 = arith.constant 0 : index
    %6 = vector.load %arg4[%c0_5, %c0_6] : memref<16x128xf32, #tpu.memory_space<vmem>>, vector<16x128xf32>
    %7 = arith.addf %5, %6 : vector<16x128xf32>
    %c0_7 = arith.constant 0 : index
    %c0_8 = arith.constant 0 : index
    %8 = vector.load %arg5[%c0_7, %c0_8] : memref<16x128xf32, #tpu.memory_space<vmem>>, vector<16x128xf32>
    tpu.vector_store %arg5[%c0_7, %c0_8], %7 {strides = array<i32>} : memref<16x128xf32, #tpu.memory_space<vmem>>, vector<16x128xf32>,
    return
  }
  func.func @transform_0(%arg0: i32) -> (i32, i32) {
    %c0_i32 = arith.constant 0 : i32
    %c0_i32_0 = arith.constant 0 : i32
    return %arg0, %c0_i32 : i32, i32
  }
  func.func @transform_1(%arg0: i32) -> (i32, i32) {
    %c0_i32 = arith.constant 0 : i32
    %c0_i32_0 = arith.constant 0 : i32
    %c0_i32_1 = arith.constant 0 : i32
    return %c0_i32, %c0_i32_0 : i32, i32
  }
  func.func @transform_2(%arg0: i32) -> (i32, i32) {
    %c0_i32 = arith.constant 0 : i32
    %c0_i32_0 = arith.constant 0 : i32
    %c0_i32_1 = arith.constant 0 : i32
    return %c0_i32, %c0_i32_0 : i32, i32
  }
  func.func @transform_3(%arg0: i32) -> (i32, i32) {
    %c0_i32 = arith.constant 0 : i32
    %c0_i32_0 = arith.constant 0 : i32
    return %arg0, %c0_i32 : i32, i32
  }
  func.func @transform_4(%arg0: i32) -> (i32, i32) {
    %c0_i32 = arith.constant 0 : i32
    %c0_i32_0 = arith.constant 0 : i32
    return %arg0, %c0_i32 : i32, i32
  }
}

module attributes {stable_mosaic.version = 11 : i64} {
  func.func @_ln_linear_kernel(%arg0: i32, %arg1: memref<16x128xf32, #tpu.memory_space<vmem>>, %arg2: memref<1x128xf32, #tpu.memory_space<vmem>>, %arg3: memref<1x128xf32, #tpu.memory_space<vmem>>, %arg4: memref<128x128xf32, #tpu.memory_space<vmem>>, %arg5: memref<1x128xf32, #tpu.memory_space<vmem>>, %arg6: memref<16x128xf32, #tpu.memory_space<vmem>>) attributes {dimension_semantics = [#tpu.dimension_semantics<parallel>], iteration_bounds = array<i64: 1>, scalar_prefetch = 0 : i64, scratch_operands = 0 : i64, tpu.core_type = #tpu.core_type<tc>, window_params = [{transform_indices = @transform_0, window_bounds = array<i64: 16, 128>}, {pipeline_mode = #tpu.pipeline_mode<synchronous>, transform_indices = @transform_1, window_bounds = array<i64: 1, 128>}, {pipeline_mode = #tpu.pipeline_mode<synchronous>, transform_indices = @transform_2, window_bounds = array<i64: 1, 128>}, {pipeline_mode = #tpu.pipeline_mode<synchronous>, transform_indices = @transform_3, window_bounds = array<i64: 128, 128>}, {pipeline_mode = #tpu.pipeline_mode<synchronous>, transform_indices = @transform_4, window_bounds = array<i64: 1, 128>}, {transform_indices = @transform_5, window_bounds = array<i64: 16, 128>}]} {
    %c0 = arith.constant 0 : index
    %c0_0 = arith.constant 0 : index
    %0 = vector.load %arg1[%c0, %c0_0] : memref<16x128xf32, #tpu.memory_space<vmem>>, vector<16x128xf32>
    %cst = arith.constant dense<0.000000e+00> : vector<16xf32>
    %1 = vector.multi_reduction <add>, %0, %cst [1] : vector<16x128xf32> to vector<16xf32>
    %2 = vector.shape_cast %1 : vector<16xf32> to vector<16x1xf32>
    %cst_1 = arith.constant 1.280000e+02 : f32
    %3 = vector.broadcast %cst_1 : f32 to vector<16x1xf32>
    %4 = arith.divf %2, %3 : vector<16x1xf32>
    %5 = vector.broadcast %4 : vector<16x1xf32> to vector<16x128xf32>
    %6 = arith.subf %0, %5 : vector<16x128xf32>
    %7 = arith.mulf %6, %6 : vector<16x128xf32>
    %cst_2 = arith.constant dense<0.000000e+00> : vector<16xf32>
    %8 = vector.multi_reduction <add>, %7, %cst_2 [1] : vector<16x128xf32> to vector<16xf32>
    %9 = vector.shape_cast %8 : vector<16xf32> to vector<16x1xf32>
    %cst_3 = arith.constant 0.00787401571 : f32
    %10 = vector.broadcast %cst_3 : f32 to vector<16x1xf32>
    %11 = arith.mulf %9, %10 : vector<16x1xf32>
    %c0_4 = arith.constant 0 : index
    %c0_5 = arith.constant 0 : index
    %12 = vector.load %arg2[%c0_4, %c0_5] : memref<1x128xf32, #tpu.memory_space<vmem>>, vector<1x128xf32>
    %13 = vector.broadcast %12 : vector<1x128xf32> to vector<16x128xf32>
    %14 = arith.mulf %13, %6 : vector<16x128xf32>
    %15 = math.sqrt %11 : vector<16x1xf32>
    %cst_6 = arith.constant 9.99999997E-7 : f32
    %16 = vector.broadcast %cst_6 : f32 to vector<16x1xf32>
    %17 = arith.addf %15, %16 : vector<16x1xf32>
    %18 = vector.broadcast %17 : vector<16x1xf32> to vector<16x128xf32>
    %19 = arith.divf %14, %18 : vector<16x128xf32>
    %c0_7 = arith.constant 0 : index
    %c0_8 = arith.constant 0 : index
    %20 = vector.load %arg3[%c0_7, %c0_8] : memref<1x128xf32, #tpu.memory_space<vmem>>, vector<1x128xf32>
    %21 = vector.broadcast %20 : vector<1x128xf32> to vector<16x128xf32>
    %22 = arith.addf %19, %21 : vector<16x128xf32>
    %c0_9 = arith.constant 0 : index
    %c0_10 = arith.constant 0 : index
    %23 = vector.load %arg4[%c0_9, %c0_10] : memref<128x128xf32, #tpu.memory_space<vmem>>, vector<128x128xf32>
    %cst_11 = arith.constant dense<0.000000e+00> : vector<16x128xf32>
    %24 = tpu.matmul %22, %23, %cst_11 {dimension_numbers = #tpu.dot_dimension_numbers<[1], [0], [0], [1], [0, 0, 1, 1], [], []>} : vector<16x128xf32>, vector<128x128xf32>, vector<16x128xf32> -> vector<16x128xf32>
    %c0_12 = arith.constant 0 : index
    %c0_13 = arith.constant 0 : index
    %25 = vector.load %arg5[%c0_12, %c0_13] : memref<1x128xf32, #tpu.memory_space<vmem>>, vector<1x128xf32>
    %26 = vector.broadcast %25 : vector<1x128xf32> to vector<16x128xf32>
    %27 = arith.addf %24, %26 : vector<16x128xf32>
    %c0_14 = arith.constant 0 : index
    %c0_15 = arith.constant 0 : index
    %28 = vector.load %arg6[%c0_14, %c0_15] : memref<16x128xf32, #tpu.memory_space<vmem>>, vector<16x128xf32>
    tpu.vector_store %arg6[%c0_14, %c0_15], %27 {strides = array<i32>} : memref<16x128xf32, #tpu.memory_space<vmem>>, vector<16x128xf32>,
    return
  }
  func.func @transform_0(%arg0: i32) -> (i32, i32) {
    %c0_i32 = arith.constant 0 : i32
    %c0_i32_0 = arith.constant 0 : i32
    return %arg0, %c0_i32 : i32, i32
  }
  func.func @transform_1(%arg0: i32) -> (i32, i32) {
    %c0_i32 = arith.constant 0 : i32
    %c0_i32_0 = arith.constant 0 : i32
    %c0_i32_1 = arith.constant 0 : i32
    return %c0_i32, %c0_i32_0 : i32, i32
  }
  func.func @transform_2(%arg0: i32) -> (i32, i32) {
    %c0_i32 = arith.constant 0 : i32
    %c0_i32_0 = arith.constant 0 : i32
    %c0_i32_1 = arith.constant 0 : i32
    return %c0_i32, %c0_i32_0 : i32, i32
  }
  func.func @transform_3(%arg0: i32) -> (i32, i32) {
    %c0_i32 = arith.constant 0 : i32
    %c0_i32_0 = arith.constant 0 : i32
    %c0_i32_1 = arith.constant 0 : i32
    return %c0_i32, %c0_i32_0 : i32, i32
  }
  func.func @transform_4(%arg0: i32) -> (i32, i32) {
    %c0_i32 = arith.constant 0 : i32
    %c0_i32_0 = arith.constant 0 : i32
    %c0_i32_1 = arith.constant 0 : i32
    return %c0_i32, %c0_i32_0 : i32, i32
  }
  func.func @transform_5(%arg0: i32) -> (i32, i32) {
    %c0_i32 = arith.constant 0 : i32
    %c0_i32_0 = arith.constant 0 : i32
    return %arg0, %c0_i32 : i32, i32
  }
}

module attributes {stable_mosaic.version = 11 : i64} {
  func.func @_linear_kernel(%arg0: i32, %arg1: memref<16x128xf32, #tpu.memory_space<vmem>>, %arg2: memref<128x256xf32, #tpu.memory_space<vmem>>, %arg3: memref<1x256xf32, #tpu.memory_space<vmem>>, %arg4: memref<16x256xf32, #tpu.memory_space<vmem>>) attributes {dimension_semantics = [#tpu.dimension_semantics<parallel>], iteration_bounds = array<i64: 1>, scalar_prefetch = 0 : i64, scratch_operands = 0 : i64, tpu.core_type = #tpu.core_type<tc>, window_params = [{transform_indices = @transform_0, window_bounds = array<i64: 16, 128>}, {pipeline_mode = #tpu.pipeline_mode<synchronous>, transform_indices = @transform_1, window_bounds = array<i64: 128, 256>}, {pipeline_mode = #tpu.pipeline_mode<synchronous>, transform_indices = @transform_2, window_bounds = array<i64: 1, 256>}, {transform_indices = @transform_3, window_bounds = array<i64: 16, 256>}]} {
    %c0 = arith.constant 0 : index
    %c0_0 = arith.constant 0 : index
    %0 = vector.load %arg1[%c0, %c0_0] : memref<16x128xf32, #tpu.memory_space<vmem>>, vector<16x128xf32>
    %c0_1 = arith.constant 0 : index
    %c0_2 = arith.constant 0 : index
    %1 = vector.load %arg2[%c0_1, %c0_2] : memref<128x256xf32, #tpu.memory_space<vmem>>, vector<128x256xf32>
    %cst = arith.constant dense<0.000000e+00> : vector<16x256xf32>
    %2 = tpu.matmul %0, %1, %cst {dimension_numbers = #tpu.dot_dimension_numbers<[1], [0], [0], [1], [0, 0, 1, 1], [], []>} : vector<16x128xf32>, vector<128x256xf32>, vector<16x256xf32> -> vector<16x256xf32>
    %c0_3 = arith.constant 0 : index
    %c0_4 = arith.constant 0 : index
    %3 = vector.load %arg3[%c0_3, %c0_4] : memref<1x256xf32, #tpu.memory_space<vmem>>, vector<1x256xf32>
    %4 = vector.broadcast %3 : vector<1x256xf32> to vector<16x256xf32>
    %5 = arith.addf %2, %4 : vector<16x256xf32>
    %c0_5 = arith.constant 0 : index
    %c0_6 = arith.constant 0 : index
    %6 = vector.load %arg4[%c0_5, %c0_6] : memref<16x256xf32, #tpu.memory_space<vmem>>, vector<16x256xf32>
    tpu.vector_store %arg4[%c0_5, %c0_6], %5 {strides = array<i32>} : memref<16x256xf32, #tpu.memory_space<vmem>>, vector<16x256xf32>,
    return
  }
  func.func @transform_0(%arg0: i32) -> (i32, i32) {
    %c0_i32 = arith.constant 0 : i32
    %c0_i32_0 = arith.constant 0 : i32
    return %arg0, %c0_i32 : i32, i32
  }
  func.func @transform_1(%arg0: i32) -> (i32, i32) {
    %c0_i32 = arith.constant 0 : i32
    %c0_i32_0 = arith.constant 0 : i32
    %c0_i32_1 = arith.constant 0 : i32
    return %c0_i32, %c0_i32_0 : i32, i32
  }
  func.func @transform_2(%arg0: i32) -> (i32, i32) {
    %c0_i32 = arith.constant 0 : i32
    %c0_i32_0 = arith.constant 0 : i32
    %c0_i32_1 = arith.constant 0 : i32
    return %c0_i32, %c0_i32_0 : i32, i32
  }
  func.func @transform_3(%arg0: i32) -> (i32, i32) {
    %c0_i32 = arith.constant 0 : i32
    %c0_i32_0 = arith.constant 0 : i32
    return %arg0, %c0_i32 : i32, i32
  }
}

module attributes {stable_mosaic.version = 11 : i64} {
  func.func @_ln_linear_kernel(%arg0: i32, %arg1: memref<16x128xf32, #tpu.memory_space<vmem>>, %arg2: memref<1x128xf32, #tpu.memory_space<vmem>>, %arg3: memref<1x128xf32, #tpu.memory_space<vmem>>, %arg4: memref<128x256xf32, #tpu.memory_space<vmem>>, %arg5: memref<1x256xf32, #tpu.memory_space<vmem>>, %arg6: memref<16x256xf32, #tpu.memory_space<vmem>>) attributes {dimension_semantics = [#tpu.dimension_semantics<parallel>], iteration_bounds = array<i64: 1>, scalar_prefetch = 0 : i64, scratch_operands = 0 : i64, tpu.core_type = #tpu.core_type<tc>, window_params = [{transform_indices = @transform_0, window_bounds = array<i64: 16, 128>}, {pipeline_mode = #tpu.pipeline_mode<synchronous>, transform_indices = @transform_1, window_bounds = array<i64: 1, 128>}, {pipeline_mode = #tpu.pipeline_mode<synchronous>, transform_indices = @transform_2, window_bounds = array<i64: 1, 128>}, {pipeline_mode = #tpu.pipeline_mode<synchronous>, transform_indices = @transform_3, window_bounds = array<i64: 128, 256>}, {pipeline_mode = #tpu.pipeline_mode<synchronous>, transform_indices = @transform_4, window_bounds = array<i64: 1, 256>}, {transform_indices = @transform_5, window_bounds = array<i64: 16, 256>}]} {
    %c0 = arith.constant 0 : index
    %c0_0 = arith.constant 0 : index
    %0 = vector.load %arg1[%c0, %c0_0] : memref<16x128xf32, #tpu.memory_space<vmem>>, vector<16x128xf32>
    %cst = arith.constant dense<0.000000e+00> : vector<16xf32>
    %1 = vector.multi_reduction <add>, %0, %cst [1] : vector<16x128xf32> to vector<16xf32>
    %2 = vector.shape_cast %1 : vector<16xf32> to vector<16x1xf32>
    %cst_1 = arith.constant 1.280000e+02 : f32
    %3 = vector.broadcast %cst_1 : f32 to vector<16x1xf32>
    %4 = arith.divf %2, %3 : vector<16x1xf32>
    %5 = vector.broadcast %4 : vector<16x1xf32> to vector<16x128xf32>
    %6 = arith.subf %0, %5 : vector<16x128xf32>
    %7 = arith.mulf %6, %6 : vector<16x128xf32>
    %cst_2 = arith.constant dense<0.000000e+00> : vector<16xf32>
    %8 = vector.multi_reduction <add>, %7, %cst_2 [1] : vector<16x128xf32> to vector<16xf32>
    %9 = vector.shape_cast %8 : vector<16xf32> to vector<16x1xf32>
    %cst_3 = arith.constant 0.00787401571 : f32
    %10 = vector.broadcast %cst_3 : f32 to vector<16x1xf32>
    %11 = arith.mulf %9, %10 : vector<16x1xf32>
    %c0_4 = arith.constant 0 : index
    %c0_5 = arith.constant 0 : index
    %12 = vector.load %arg2[%c0_4, %c0_5] : memref<1x128xf32, #tpu.memory_space<vmem>>, vector<1x128xf32>
    %13 = vector.broadcast %12 : vector<1x128xf32> to vector<16x128xf32>
    %14 = arith.mulf %13, %6 : vector<16x128xf32>
    %15 = math.sqrt %11 : vector<16x1xf32>
    %cst_6 = arith.constant 9.99999997E-7 : f32
    %16 = vector.broadcast %cst_6 : f32 to vector<16x1xf32>
    %17 = arith.addf %15, %16 : vector<16x1xf32>
    %18 = vector.broadcast %17 : vector<16x1xf32> to vector<16x128xf32>
    %19 = arith.divf %14, %18 : vector<16x128xf32>
    %c0_7 = arith.constant 0 : index
    %c0_8 = arith.constant 0 : index
    %20 = vector.load %arg3[%c0_7, %c0_8] : memref<1x128xf32, #tpu.memory_space<vmem>>, vector<1x128xf32>
    %21 = vector.broadcast %20 : vector<1x128xf32> to vector<16x128xf32>
    %22 = arith.addf %19, %21 : vector<16x128xf32>
    %c0_9 = arith.constant 0 : index
    %c0_10 = arith.constant 0 : index
    %23 = vector.load %arg4[%c0_9, %c0_10] : memref<128x256xf32, #tpu.memory_space<vmem>>, vector<128x256xf32>
    %cst_11 = arith.constant dense<0.000000e+00> : vector<16x256xf32>
    %24 = tpu.matmul %22, %23, %cst_11 {dimension_numbers = #tpu.dot_dimension_numbers<[1], [0], [0], [1], [0, 0, 1, 1], [], []>} : vector<16x128xf32>, vector<128x256xf32>, vector<16x256xf32> -> vector<16x256xf32>
    %c0_12 = arith.constant 0 : index
    %c0_13 = arith.constant 0 : index
    %25 = vector.load %arg5[%c0_12, %c0_13] : memref<1x256xf32, #tpu.memory_space<vmem>>, vector<1x256xf32>
    %26 = vector.broadcast %25 : vector<1x256xf32> to vector<16x256xf32>
    %27 = arith.addf %24, %26 : vector<16x256xf32>
    %cst_14 = arith.constant 0.000000e+00 : f32
    %28 = vector.broadcast %cst_14 : f32 to vector<16x256xf32>
    %29 = arith.maximumf %27, %28 : vector<16x256xf32>
    %c0_15 = arith.constant 0 : index
    %c0_16 = arith.constant 0 : index
    %30 = vector.load %arg6[%c0_15, %c0_16] : memref<16x256xf32, #tpu.memory_space<vmem>>, vector<16x256xf32>
    tpu.vector_store %arg6[%c0_15, %c0_16], %29 {strides = array<i32>} : memref<16x256xf32, #tpu.memory_space<vmem>>, vector<16x256xf32>,
    return
  }
  func.func @transform_0(%arg0: i32) -> (i32, i32) {
    %c0_i32 = arith.constant 0 : i32
    %c0_i32_0 = arith.constant 0 : i32
    return %arg0, %c0_i32 : i32, i32
  }
  func.func @transform_1(%arg0: i32) -> (i32, i32) {
    %c0_i32 = arith.constant 0 : i32
    %c0_i32_0 = arith.constant 0 : i32
    %c0_i32_1 = arith.constant 0 : i32
    return %c0_i32, %c0_i32_0 : i32, i32
  }
  func.func @transform_2(%arg0: i32) -> (i32, i32) {
    %c0_i32 = arith.constant 0 : i32
    %c0_i32_0 = arith.constant 0 : i32
    %c0_i32_1 = arith.constant 0 : i32
    return %c0_i32, %c0_i32_0 : i32, i32
  }
  func.func @transform_3(%arg0: i32) -> (i32, i32) {
    %c0_i32 = arith.constant 0 : i32
    %c0_i32_0 = arith.constant 0 : i32
    %c0_i32_1 = arith.constant 0 : i32
    return %c0_i32, %c0_i32_0 : i32, i32
  }
  func.func @transform_4(%arg0: i32) -> (i32, i32) {
    %c0_i32 = arith.constant 0 : i32
    %c0_i32_0 = arith.constant 0 : i32
    %c0_i32_1 = arith.constant 0 : i32
    return %c0_i32, %c0_i32_0 : i32, i32
  }
  func.func @transform_5(%arg0: i32) -> (i32, i32) {
    %c0_i32 = arith.constant 0 : i32
    %c0_i32_0 = arith.constant 0 : i32
    return %arg0, %c0_i32 : i32, i32
  }
}

module attributes {stable_mosaic.version = 11 : i64} {
  func.func @_linear_res_kernel(%arg0: i32, %arg1: memref<16x256xf32, #tpu.memory_space<vmem>>, %arg2: memref<256x128xf32, #tpu.memory_space<vmem>>, %arg3: memref<1x128xf32, #tpu.memory_space<vmem>>, %arg4: memref<16x128xf32, #tpu.memory_space<vmem>>, %arg5: memref<16x128xf32, #tpu.memory_space<vmem>>) attributes {dimension_semantics = [#tpu.dimension_semantics<parallel>], iteration_bounds = array<i64: 1>, scalar_prefetch = 0 : i64, scratch_operands = 0 : i64, tpu.core_type = #tpu.core_type<tc>, window_params = [{transform_indices = @transform_0, window_bounds = array<i64: 16, 256>}, {pipeline_mode = #tpu.pipeline_mode<synchronous>, transform_indices = @transform_1, window_bounds = array<i64: 256, 128>}, {pipeline_mode = #tpu.pipeline_mode<synchronous>, transform_indices = @transform_2, window_bounds = array<i64: 1, 128>}, {transform_indices = @transform_3, window_bounds = array<i64: 16, 128>}, {transform_indices = @transform_4, window_bounds = array<i64: 16, 128>}]} {
    %c0 = arith.constant 0 : index
    %c0_0 = arith.constant 0 : index
    %0 = vector.load %arg1[%c0, %c0_0] : memref<16x256xf32, #tpu.memory_space<vmem>>, vector<16x256xf32>
    %c0_1 = arith.constant 0 : index
    %c0_2 = arith.constant 0 : index
    %1 = vector.load %arg2[%c0_1, %c0_2] : memref<256x128xf32, #tpu.memory_space<vmem>>, vector<256x128xf32>
    %cst = arith.constant dense<0.000000e+00> : vector<16x128xf32>
    %2 = tpu.matmul %0, %1, %cst {dimension_numbers = #tpu.dot_dimension_numbers<[1], [0], [0], [1], [0, 0, 1, 1], [], []>} : vector<16x256xf32>, vector<256x128xf32>, vector<16x128xf32> -> vector<16x128xf32>
    %c0_3 = arith.constant 0 : index
    %c0_4 = arith.constant 0 : index
    %3 = vector.load %arg3[%c0_3, %c0_4] : memref<1x128xf32, #tpu.memory_space<vmem>>, vector<1x128xf32>
    %4 = vector.broadcast %3 : vector<1x128xf32> to vector<16x128xf32>
    %5 = arith.addf %2, %4 : vector<16x128xf32>
    %c0_5 = arith.constant 0 : index
    %c0_6 = arith.constant 0 : index
    %6 = vector.load %arg4[%c0_5, %c0_6] : memref<16x128xf32, #tpu.memory_space<vmem>>, vector<16x128xf32>
    %7 = arith.addf %5, %6 : vector<16x128xf32>
    %c0_7 = arith.constant 0 : index
    %c0_8 = arith.constant 0 : index
    %8 = vector.load %arg5[%c0_7, %c0_8] : memref<16x128xf32, #tpu.memory_space<vmem>>, vector<16x128xf32>
    tpu.vector_store %arg5[%c0_7, %c0_8], %7 {strides = array<i32>} : memref<16x128xf32, #tpu.memory_space<vmem>>, vector<16x128xf32>,
    return
  }
  func.func @transform_0(%arg0: i32) -> (i32, i32) {
    %c0_i32 = arith.constant 0 : i32
    %c0_i32_0 = arith.constant 0 : i32
    return %arg0, %c0_i32 : i32, i32
  }
  func.func @transform_1(%arg0: i32) -> (i32, i32) {
    %c0_i32 = arith.constant 0 : i32
    %c0_i32_0 = arith.constant 0 : i32
    %c0_i32_1 = arith.constant 0 : i32
    return %c0_i32, %c0_i32_0 : i32, i32
  }
  func.func @transform_2(%arg0: i32) -> (i32, i32) {
    %c0_i32 = arith.constant 0 : i32
    %c0_i32_0 = arith.constant 0 : i32
    %c0_i32_1 = arith.constant 0 : i32
    return %c0_i32, %c0_i32_0 : i32, i32
  }
  func.func @transform_3(%arg0: i32) -> (i32, i32) {
    %c0_i32 = arith.constant 0 : i32
    %c0_i32_0 = arith.constant 0 : i32
    return %arg0, %c0_i32 : i32, i32
  }
  func.func @transform_4(%arg0: i32) -> (i32, i32) {
    %c0_i32 = arith.constant 0 : i32
    %c0_i32_0 = arith.constant 0 : i32
    return %arg0, %c0_i32 : i32, i32
  }
}

module attributes {stable_mosaic.version = 11 : i64} {
  func.func @_final_kernel(%arg0: i32, %arg1: memref<16x128xf32, #tpu.memory_space<vmem>>, %arg2: memref<1x128xf32, #tpu.memory_space<vmem>>, %arg3: memref<1x128xf32, #tpu.memory_space<vmem>>, %arg4: memref<16x128xf32, #tpu.memory_space<vmem>>, %arg5: memref<128x128xf32, #tpu.memory_space<vmem>>, %arg6: memref<128x128xf32, #tpu.memory_space<vmem>>, %arg7: memref<1x128xf32, #tpu.memory_space<vmem>>, %arg8: memref<16x128xf32, #tpu.memory_space<vmem>>) attributes {dimension_semantics = [#tpu.dimension_semantics<parallel>], iteration_bounds = array<i64: 1>, scalar_prefetch = 0 : i64, scratch_operands = 0 : i64, tpu.core_type = #tpu.core_type<tc>, window_params = [{transform_indices = @transform_0, window_bounds = array<i64: 16, 128>}, {pipeline_mode = #tpu.pipeline_mode<synchronous>, transform_indices = @transform_1, window_bounds = array<i64: 1, 128>}, {pipeline_mode = #tpu.pipeline_mode<synchronous>, transform_indices = @transform_2, window_bounds = array<i64: 1, 128>}, {transform_indices = @transform_3, window_bounds = array<i64: 16, 128>}, {pipeline_mode = #tpu.pipeline_mode<synchronous>, transform_indices = @transform_4, window_bounds = array<i64: 128, 128>}, {pipeline_mode = #tpu.pipeline_mode<synchronous>, transform_indices = @transform_5, window_bounds = array<i64: 128, 128>}, {pipeline_mode = #tpu.pipeline_mode<synchronous>, transform_indices = @transform_6, window_bounds = array<i64: 1, 128>}, {transform_indices = @transform_7, window_bounds = array<i64: 16, 128>}]} {
    %c0 = arith.constant 0 : index
    %c0_0 = arith.constant 0 : index
    %0 = vector.load %arg1[%c0, %c0_0] : memref<16x128xf32, #tpu.memory_space<vmem>>, vector<16x128xf32>
    %cst = arith.constant dense<0.000000e+00> : vector<16xf32>
    %1 = vector.multi_reduction <add>, %0, %cst [1] : vector<16x128xf32> to vector<16xf32>
    %2 = vector.shape_cast %1 : vector<16xf32> to vector<16x1xf32>
    %cst_1 = arith.constant 1.280000e+02 : f32
    %3 = vector.broadcast %cst_1 : f32 to vector<16x1xf32>
    %4 = arith.divf %2, %3 : vector<16x1xf32>
    %5 = vector.broadcast %4 : vector<16x1xf32> to vector<16x128xf32>
    %6 = arith.subf %0, %5 : vector<16x128xf32>
    %7 = arith.mulf %6, %6 : vector<16x128xf32>
    %cst_2 = arith.constant dense<0.000000e+00> : vector<16xf32>
    %8 = vector.multi_reduction <add>, %7, %cst_2 [1] : vector<16x128xf32> to vector<16xf32>
    %9 = vector.shape_cast %8 : vector<16xf32> to vector<16x1xf32>
    %cst_3 = arith.constant 0.00787401571 : f32
    %10 = vector.broadcast %cst_3 : f32 to vector<16x1xf32>
    %11 = arith.mulf %9, %10 : vector<16x1xf32>
    %c0_4 = arith.constant 0 : index
    %c0_5 = arith.constant 0 : index
    %12 = vector.load %arg2[%c0_4, %c0_5] : memref<1x128xf32, #tpu.memory_space<vmem>>, vector<1x128xf32>
    %13 = vector.broadcast %12 : vector<1x128xf32> to vector<16x128xf32>
    %14 = arith.mulf %13, %6 : vector<16x128xf32>
    %15 = math.sqrt %11 : vector<16x1xf32>
    %cst_6 = arith.constant 9.99999997E-7 : f32
    %16 = vector.broadcast %cst_6 : f32 to vector<16x1xf32>
    %17 = arith.addf %15, %16 : vector<16x1xf32>
    %18 = vector.broadcast %17 : vector<16x1xf32> to vector<16x128xf32>
    %19 = arith.divf %14, %18 : vector<16x128xf32>
    %c0_7 = arith.constant 0 : index
    %c0_8 = arith.constant 0 : index
    %20 = vector.load %arg3[%c0_7, %c0_8] : memref<1x128xf32, #tpu.memory_space<vmem>>, vector<1x128xf32>
    %21 = vector.broadcast %20 : vector<1x128xf32> to vector<16x128xf32>
    %22 = arith.addf %19, %21 : vector<16x128xf32>
    %c0_9 = arith.constant 0 : index
    %c0_10 = arith.constant 0 : index
    %23 = vector.load %arg5[%c0_9, %c0_10] : memref<128x128xf32, #tpu.memory_space<vmem>>, vector<128x128xf32>
    %cst_11 = arith.constant dense<0.000000e+00> : vector<16x128xf32>
    %24 = tpu.matmul %22, %23, %cst_11 {dimension_numbers = #tpu.dot_dimension_numbers<[1], [0], [0], [1], [0, 0, 1, 1], [], []>} : vector<16x128xf32>, vector<128x128xf32>, vector<16x128xf32> -> vector<16x128xf32>
    %c0_12 = arith.constant 0 : index
    %c0_13 = arith.constant 0 : index
    %25 = vector.load %arg4[%c0_12, %c0_13] : memref<16x128xf32, #tpu.memory_space<vmem>>, vector<16x128xf32>
    %c0_14 = arith.constant 0 : index
    %c0_15 = arith.constant 0 : index
    %26 = vector.load %arg6[%c0_14, %c0_15] : memref<128x128xf32, #tpu.memory_space<vmem>>, vector<128x128xf32>
    %cst_16 = arith.constant dense<0.000000e+00> : vector<16x128xf32>
    %27 = tpu.matmul %25, %26, %cst_16 {dimension_numbers = #tpu.dot_dimension_numbers<[1], [0], [0], [1], [0, 0, 1, 1], [], []>} : vector<16x128xf32>, vector<128x128xf32>, vector<16x128xf32> -> vector<16x128xf32>
    %28 = arith.addf %24, %27 : vector<16x128xf32>
    %c0_17 = arith.constant 0 : index
    %c0_18 = arith.constant 0 : index
    %29 = vector.load %arg7[%c0_17, %c0_18] : memref<1x128xf32, #tpu.memory_space<vmem>>, vector<1x128xf32>
    %30 = vector.broadcast %29 : vector<1x128xf32> to vector<16x128xf32>
    %31 = arith.addf %28, %30 : vector<16x128xf32>
    %cst_19 = arith.constant 0.000000e+00 : f32
    %32 = vector.broadcast %cst_19 : f32 to vector<16x128xf32>
    %33 = arith.maximumf %31, %32 : vector<16x128xf32>
    %c0_20 = arith.constant 0 : index
    %c0_21 = arith.constant 0 : index
    %34 = vector.load %arg8[%c0_20, %c0_21] : memref<16x128xf32, #tpu.memory_space<vmem>>, vector<16x128xf32>
    tpu.vector_store %arg8[%c0_20, %c0_21], %33 {strides = array<i32>} : memref<16x128xf32, #tpu.memory_space<vmem>>, vector<16x128xf32>,
    return
  }
  func.func @transform_0(%arg0: i32) -> (i32, i32) {
    %c0_i32 = arith.constant 0 : i32
    %c0_i32_0 = arith.constant 0 : i32
    return %arg0, %c0_i32 : i32, i32
  }
  func.func @transform_1(%arg0: i32) -> (i32, i32) {
    %c0_i32 = arith.constant 0 : i32
    %c0_i32_0 = arith.constant 0 : i32
    %c0_i32_1 = arith.constant 0 : i32
    return %c0_i32, %c0_i32_0 : i32, i32
  }
  func.func @transform_2(%arg0: i32) -> (i32, i32) {
    %c0_i32 = arith.constant 0 : i32
    %c0_i32_0 = arith.constant 0 : i32
    %c0_i32_1 = arith.constant 0 : i32
    return %c0_i32, %c0_i32_0 : i32, i32
  }
  func.func @transform_3(%arg0: i32) -> (i32, i32) {
    %c0_i32 = arith.constant 0 : i32
    %c0_i32_0 = arith.constant 0 : i32
    return %arg0, %c0_i32 : i32, i32
  }
  func.func @transform_4(%arg0: i32) -> (i32, i32) {
    %c0_i32 = arith.constant 0 : i32
    %c0_i32_0 = arith.constant 0 : i32
    %c0_i32_1 = arith.constant 0 : i32
    return %c0_i32, %c0_i32_0 : i32, i32
  }
  func.func @transform_5(%arg0: i32) -> (i32, i32) {
    %c0_i32 = arith.constant 0 : i32
    %c0_i32_0 = arith.constant 0 : i32
    %c0_i32_1 = arith.constant 0 : i32
    return %c0_i32, %c0_i32_0 : i32, i32
  }
  func.func @transform_6(%arg0: i32) -> (i32, i32) {
    %c0_i32 = arith.constant 0 : i32
    %c0_i32_0 = arith.constant 0 : i32
    %c0_i32_1 = arith.constant 0 : i32
    return %c0_i32, %c0_i32_0 : i32, i32
  }
  func.func @transform_7(%arg0: i32) -> (i32, i32) {
    %c0_i32 = arith.constant 0 : i32
    %c0_i32_0 = arith.constant 0 : i32
    return %arg0, %c0_i32 : i32, i32
  }
}

</mosaic_0001>

<bundles_post_ra>
// kernel: cross_attention_forward.10
= control target key start
LH: loop header
LB: loop body
LE: loop exit
PB: predicated region body
PF: predicated region fallthrough
CT: control target
= control target key end

     0   :  { %10 = vsyncpa [#allocation3], 0  ;;  %s323_s21 = smov [#allocation2]   ;;  %s324_s23 = smov 384   ;;  %s412_s0 = inlined_call_operand.vmem [shape: f32[16,128], index: 0, kind: input, shape index: {}]   ;;  %s413_s1 = inlined_call_operand.vmem [shape: f32[1,128], index: 1, kind: input, shape index: {}]   ;;  %s414_s2 = inlined_call_operand.vmem [shape: f32[1,128], index: 2, kind: input, shape index: {}]   ;;  %s415_s3 = inlined_call_operand.hbm [shape: f32[128,384], index: 3, kind: input, shape index: {}]   ;;  %s416_s4 = inlined_call_operand.vmem [shape: f32[1,384], index: 4, kind: input, shape index: {}]   ;;  %s417_s5 = inlined_call_operand.vmem [shape: f32[16,384], index: 5, kind: output, shape index: {}]  }
   0x1   :  { %s21_s20 = sshll.u32 %s415_s3, 4  ;;  %s23_s22 = sshll.u32 %s323_s21, 4  ;;  %s22_s20 = int_to_ptr.hbm [resolvable:$true] %s21_s20  ;;  %s24_s22 = int_to_ptr.vmem [resolvable:$true] %s23_s22 }
   0x2   :  { %s325_s24 = smov 24  }
   0x3   :  { %29 = dma.hbm_to_vmem [thread:$0]  %s22_s20, 6144, %s24_s22, [#allocation3], %s324_s23, %s324_s23, %s325_s24  }
   0x4   :  { %321 = dma.done.wait [#allocation3], 6144  }
   0x5   :  { %322 = vsyncadd [#allocation3], 4294961152  ;;  %v36_v0 = vld [vmem:[%s412_s0] sm:$0xff]  ;;  %v37_v1 = vld [vmem:[%s412_s0 + $0x8] sm:$0xff]  ;;  %v326_v2 = vmov 128.0  }
   0x6   :  { %38 = vadd.xlane.f32.xlu0 %v36_v0  ;;  %287 = vrcp.f32 %v326_v2  ;;  %v174_v17 = vld [vmem:[#allocation2 + $0x168] sm:$0xff]  ;;  %v175_v18 = vld [vmem:[#allocation2 + $0x170] sm:$0xff]  ;;  %v176_v19 = vld [vmem:[#allocation2 + $0x178] sm:$0xff] }
   0x7   :  { %185 = vmatpush.msra.mxu0 %v174_v17  ;;  %208 = vmatpush.msra.mxu1 %v175_v18  ;;  %v171_v20 = vld [vmem:[#allocation2 + $0x150] sm:$0xff]  ;;  %v172_v21 = vld [vmem:[#allocation2 + $0x158] sm:$0xff]  ;;  %v173_v22 = vld [vmem:[#allocation2 + $0x160] sm:$0xff] }
   0x8   :  { %231 = vmatpush.msra.mxu2 %v176_v19  ;;  %265 = vmatpush.msra.mxu3 %v174_v17  ;;  %v168_v23 = vld [vmem:[#allocation2 + $0x138] sm:$0xff]  ;;  %v169_v24 = vld [vmem:[#allocation2 + $0x140] sm:$0xff]  ;;  %v170_v25 = vld [vmem:[#allocation2 + $0x148] sm:$0xff] }
   0x9   :  { %186 = vmatpush.msra.mxu0 %v171_v20  ;;  %209 = vmatpush.msra.mxu1 %v172_v21  ;;  %v165_v26 = vld [vmem:[#allocation2 + $0x120] sm:$0xff]  ;;  %v166_v27 = vld [vmem:[#allocation2 + $0x128] sm:$0xff]  ;;  %v167_v28 = vld [vmem:[#allocation2 + $0x130] sm:$0xff] }
   0xa   :  { %232 = vmatpush.msra.mxu2 %v173_v22  ;;  %266 = vmatpush.msra.mxu3 %v171_v20  ;;  %v162_v29 = vld [vmem:[#allocation2 + $0x108] sm:$0xff]  ;;  %v163_v30 = vld [vmem:[#allocation2 + $0x110] sm:$0xff]  ;;  %v164_v31 = vld [vmem:[#allocation2 + $0x118] sm:$0xff] }
   0xb   :  { %187 = vmatpush.msra.mxu0 %v168_v23  ;;  %210 = vmatpush.msra.mxu1 %v169_v24  ;;  %v159_v32 = vld [vmem:[#allocation2 + $0xf0] sm:$0xff]  ;;  %v160_v33 = vld [vmem:[#allocation2 + $0xf8] sm:$0xff]  ;;  %v161_v34 = vld [vmem:[#allocation2 + $0x100] sm:$0xff] }
   0xc   :  { %v288_v3 = vpop.eup %287  ;;  %233 = vmatpush.msra.mxu2 %v170_v25  ;;  %267 = vmatpush.msra.mxu3 %v168_v23  ;;  %v156_v35 = vld [vmem:[#allocation2 + $0xd8] sm:$0xff]  ;;  %v157_v36 = vld [vmem:[#allocation2 + $0xe0] sm:$0xff]  ;;  %v158_v37 = vld [vmem:[#allocation2 + $0xe8] sm:$0xff] }
   0xd   :  { %v43_v4 = vmul.f32 128.0, %v288_v3  ;;  %vm47_vm0 = vweird.f32 %v288_v3  ;;  %188 = vmatpush.msra.mxu0 %v165_v26  ;;  %211 = vmatpush.msra.mxu1 %v166_v27  ;;  %v153_v38 = vld [vmem:[#allocation2 + $0xc0] sm:$0xff]  ;;  %v154_v39 = vld [vmem:[#allocation2 + $0xc8] sm:$0xff]  ;;  %v155_v40 = vld [vmem:[#allocation2 + $0xd0] sm:$0xff] }
   0xe   :  { %40 = vadd.xlane.f32.xlu0 %v37_v1  ;;  %234 = vmatpush.msra.mxu2 %v167_v28  ;;  %v150_v41 = vld [vmem:[#allocation2 + $0xa8] sm:$0xff]  ;;  %v151_v42 = vld [vmem:[#allocation2 + $0xb0] sm:$0xff]  ;;  %v152_v43 = vld [vmem:[#allocation2 + $0xb8] sm:$0xff] }
   0xf   :  { %v44_v5 = vsub.f32 1.0, %v43_v4  ;;  %268 = vmatpush.msra.mxu3 %v165_v26  ;;  %189 = vmatpush.msra.mxu0 %v162_v29  ;;  %v147_v44 = vld [vmem:[#allocation2 + $0x90] sm:$0xff]  ;;  %v148_v45 = vld [vmem:[#allocation2 + $0x98] sm:$0xff]  ;;  %v149_v47 = vld [vmem:[#allocation2 + $0xa0] sm:$0xff] }
  0x10   :  { %212 = vmatpush.msra.mxu1 %v163_v30  ;;  %235 = vmatpush.msra.mxu2 %v164_v31  ;;  %v144_v49 = vld [vmem:[#allocation2 + $0x78] sm:$0xff]  ;;  %v145_v50 = vld [vmem:[#allocation2 + $0x80] sm:$0xff]  ;;  %v146_v51 = vld [vmem:[#allocation2 + $0x88] sm:$0xff] }
  0x11   :  { %v45_v6 = vmul.f32 %v288_v3, %v44_v5  ;;  %269 = vmatpush.msra.mxu3 %v162_v29  ;;  %190 = vmatpush.msra.mxu0 %v159_v32  ;;  %v141_v52 = vld [vmem:[#allocation2 + $0x60] sm:$0xff]  ;;  %v142_v53 = vld [vmem:[#allocation2 + $0x68] sm:$0xff]  ;;  %v143_v54 = vld [vmem:[#allocation2 + $0x70] sm:$0xff] }
  0x12   :  { %213 = vmatpush.msra.mxu1 %v160_v33  ;;  %236 = vmatpush.msra.mxu2 %v161_v34  ;;  %v138_v55 = vld [vmem:[#allocation2 + $0x48] sm:$0xff]  ;;  %v139_v56 = vld [vmem:[#allocation2 + $0x50] sm:$0xff]  ;;  %v140_v57 = vld [vmem:[#allocation2 + $0x58] sm:$0xff] }
  0x13   :  { %v46_v7 = vadd.f32 %v288_v3, %v45_v6  ;;  %270 = vmatpush.msra.mxu3 %v159_v32  ;;  %191 = vmatpush.msra.mxu0 %v156_v35  ;;  %v135_v58 = vld [vmem:[#allocation2 + $0x30] sm:$0xff]  ;;  %v136_v59 = vld [vmem:[#allocation2 + $0x38] sm:$0xff]  ;;  %v137_v61 = vld [vmem:[#allocation2 + $0x40] sm:$0xff] }
  0x14   :  { %214 = vmatpush.msra.mxu1 %v157_v36  ;;  %237 = vmatpush.msra.mxu2 %v158_v37  ;;  %v129_v4 = vld [vmem:[#allocation2] sm:$0xff]  ;;  %v130_v5 = vld [vmem:[#allocation2 + $0x8] sm:$0xff] }
  0x15   :  { %v48_v8 = vsel %vm47_vm0, %v288_v3, %v46_v7  ;;  %271 = vmatpush.msra.mxu3 %v156_v35  ;;  %192 = vmatpush.msra.mxu0 %v153_v38  ;;  %v134_v3 = vld [vmem:[#allocation2 + $0x28] sm:$0xff]  ;;  %v131_v7 = vld [vmem:[#allocation2 + $0x10] sm:$0xff]  ;;  %v285_v33 = vld [vmem:[%s413_s1] ss:$0 sm:$0xff] }
  0x16   :  { %215 = vmatpush.msra.mxu1 %v154_v39  ;;  %238 = vmatpush.msra.mxu2 %v155_v40 }
  0x17   :  { %272 = vmatpush.msra.mxu3 %v153_v38  ;;  %193 = vmatpush.msra.mxu0 %v150_v41 }
  0x18   :  { %216 = vmatpush.msra.mxu1 %v151_v42  ;;  %239 = vmatpush.msra.mxu2 %v152_v43 }
  0x19   :  { %273 = vmatpush.msra.mxu3 %v150_v41  ;;  %194 = vmatpush.msra.mxu0 %v147_v44  ;;  %v286_v41 = vld [vmem:[%s414_s2] ss:$0 sm:$0xff] }
  0x1a   :  { %217 = vmatpush.msra.mxu1 %v148_v45  ;;  %240 = vmatpush.msra.mxu2 %v149_v47 }
  0x1b   :  { %274 = vmatpush.msra.mxu3 %v147_v44  ;;  %195 = vmatpush.msra.mxu0 %v144_v49 }
  0x1c   :  { %218 = vmatpush.msra.mxu1 %v145_v50  ;;  %241 = vmatpush.msra.mxu2 %v146_v51 }
  0x1d   :  { %275 = vmatpush.msra.mxu3 %v144_v49  ;;  %196 = vmatpush.msra.mxu0 %v141_v52 }
  0x1e   :  { %219 = vmatpush.msra.mxu1 %v142_v53  ;;  %242 = vmatpush.msra.mxu2 %v143_v54 }
  0x1f   :  { %276 = vmatpush.msra.mxu3 %v141_v52  ;;  %197 = vmatpush.msra.mxu0 %v138_v55 }
  0x20   :  { %220 = vmatpush.msra.mxu1 %v139_v56  ;;  %243 = vmatpush.msra.mxu2 %v140_v57  ;;  %v177_v56 = vld [vmem:[%s416_s4] sm:$0x7] }
  0x21   :  { %277 = vmatpush.msra.mxu3 %v138_v55  ;;  %198 = vmatpush.msra.mxu0 %v135_v58  ;;  %v179_v57 = vperm.slane %v177_v56, 0 }
  0x22   :  { %221 = vmatpush.msra.mxu1 %v136_v59  ;;  %244 = vmatpush.msra.mxu2 %v137_v61 }
  0x23   :  { %278 = vmatpush.msra.mxu3 %v135_v58  ;;  %v180_v58 = vperm.slane %v177_v56, 1 }
  0x24   :  { %245 = vmatpush.msra.mxu2 %v134_v3 }
  0x26   :  { %246 = vmatpush.msra.mxu2 %v131_v7 }
  0x79   :  { %v39_v9 = vpop.xlane.xlu0 %38 }
  0x7a   :  { %v49_v10 = vmul.f32 %v48_v8, %v39_v9 }
  0x7c   :  { %v366_v11 = vsub.f32 %v36_v0, %v49_v10  ;;  %v132_v0 = vld [vmem:[#allocation2 + $0x18] sm:$0xff] }
  0x7d   :  { %199 = vmatpush.msra.mxu0 %v132_v0  ;;  %279 = vmatpush.msra.mxu3 %v132_v0 }
  0x7e   :  { %v53_v12 = vmul.f32 %v366_v11, %v366_v11  ;;  %v65_v39 = vmul.f32 %v285_v33, %v366_v11 }
  0x7f   :  { %200 = vmatpush.msra.mxu0 %v129_v4  ;;  %280 = vmatpush.msra.mxu3 %v129_v4 }
  0x80   :  { %55 = vadd.xlane.f32.xlu1 %v53_v12 }
  0x81   :  { %v41_v13 = vpop.xlane.xlu0 %40 }
  0x82   :  { %v50_v14 = vmul.f32 %v48_v8, %v41_v13 }
  0x84   :  { %v370_v15 = vsub.f32 %v37_v1, %v50_v14  ;;  %v133_v1 = vld [vmem:[#allocation2 + $0x20] sm:$0xff] }
  0x85   :  { %222 = vmatpush.msra.mxu1 %v133_v1 }
  0x86   :  { %v54_v16 = vmul.f32 %v370_v15, %v370_v15  ;;  %v66_v51 = vmul.f32 %v285_v33, %v370_v15  ;;  %v181_v15 = vperm.slane %v177_v56, 2 }
  0x87   :  { %223 = vmatpush.msra.mxu1 %v130_v5 }
  0x88   :  { %57 = vadd.xlane.f32.xlu1 %v54_v16 }
  0xf3   :  { %v56_v46 = vpop.xlane.xlu1 %55 }
  0xf4   :  { %v374_v48 = vmul.f32 0.007874016, %v56_v46 }
  0xf6   :  { %289 = vrsqrt.f32 %v374_v48  ;;  %vm74_vm1 = vcmp.eq.f32.partialorder %v374_v48, inf  ;;  %v77_v17 = vand.u32 2147483648, %v374_v48  ;;  %vm76_vm2 = vcmp.eq.f32.partialorder %v374_v48, 0.0 }
  0xfb   :  { %v58_v60 = vpop.xlane.xlu1 %57 }
  0xfc   :  { %v290_v62 = vpop.eup %289  ;;  %v60_v63 = vmul.f32 0.007874016, %v58_v60 }
  0xfd   :  { %v68_v2 = vmul.f32 %v290_v62, %v374_v48 }
  0xfe   :  { %291 = vrsqrt.f32 %v60_v63  ;;  %vm86_vm3 = vcmp.eq.f32.partialorder %v60_v63, inf  ;;  %v89_v25 = vand.u32 2147483648, %v60_v63  ;;  %vm88_vm4 = vcmp.eq.f32.partialorder %v60_v63, 0.0 }
  0xff   :  { %v69_v6 = vmul.f32 %v290_v62, %v68_v2 }
 0x101   :  { %v70_v8 = vmul.f32 0.5, %v69_v6 }
 0x103   :  { %v71_v9 = vsub.f32 1.5, %v70_v8 }
 0x104   :  { %v292_v10 = vpop.eup %291 }
 0x105   :  { %v72_v12 = vmul.f32 %v290_v62, %v71_v9  ;;  %v80_v13 = vmul.f32 %v292_v10, %v60_v63 }
 0x107   :  { %v73_v14 = vmul.f32 %v72_v12, %v374_v48  ;;  %v81_v16 = vmul.f32 %v292_v10, %v80_v13 }
 0x109   :  { %v82_v18 = vmul.f32 0.5, %v81_v16  ;;  %v75_v19 = vsel %vm74_vm1, %v374_v48, %v73_v14 }
 0x10a   :  { %v78_v20 = vsel %vm76_vm2, %v77_v17, %v75_v19 }
 0x10b   :  { %v83_v21 = vsub.f32 1.5, %v82_v18  ;;  %v91_v22 = vadd.f32 1e-06, %v78_v20 }
 0x10d   :  { %v84_v23 = vmul.f32 %v292_v10, %v83_v21  ;;  %293 = vrcp.f32 %v91_v22  ;;  %v104_v32 = vand.u32 2147483648, %v91_v22  ;;  %v102_v35 = vand.u32 2147483647, %v91_v22 }
 0x10e   :  { %vm98_vm6 = vweird.f32 %v91_v22 }
 0x10f   :  { %v85_v24 = vmul.f32 %v84_v23, %v60_v63  ;;  %v105_v38 = vor.u32 1.1754944e-38, %v104_v32  ;;  %vm103_vm8 = vcmp.eq.f32.partialorder %v102_v35, 8.507059e+37 }
 0x111   :  { %v87_v26 = vsel %vm86_vm3, %v60_v63, %v85_v24 }
 0x112   :  { %v90_v27 = vsel %vm88_vm4, %v89_v25, %v87_v26 }
 0x113   :  { %v294_v28 = vpop.eup %293  ;;  %v92_v29 = vadd.f32 1e-06, %v90_v27 }
 0x114   :  { %v94_v30 = vmul.f32 %v294_v28, %v91_v22  ;;  %vm99_vm5 = vweird.f32 %v294_v28 }
 0x115   :  { %295 = vrcp.f32 %v92_v29  ;;  %vm100_vm7 = vmor %vm98_vm6, %vm99_vm5  ;;  %v119_v46 = vand.u32 2147483648, %v92_v29  ;;  %v117_v49 = vand.u32 2147483647, %v92_v29  ;;  %vm113_vm10 = vweird.f32 %v92_v29 }
 0x116   :  { %v95_v31 = vsub.f32 1.0, %v94_v30 }
 0x117   :  { %v120_v11 = vor.u32 1.1754944e-38, %v119_v46  ;;  %vm118_vm12 = vcmp.eq.f32.partialorder %v117_v49, 8.507059e+37 }
 0x118   :  { %v96_v34 = vmul.f32 %v294_v28, %v95_v31 }
 0x11a   :  { %v97_v36 = vadd.f32 %v294_v28, %v96_v34 }
 0x11b   :  { %v296_v37 = vpop.eup %295 }
 0x11c   :  { %v101_v40 = vsel %vm100_vm7, %v294_v28, %v97_v36  ;;  %v109_v42 = vmul.f32 %v296_v37, %v92_v29  ;;  %vm114_vm9 = vweird.f32 %v296_v37 }
 0x11d   :  { %v106_v43 = vsel %vm103_vm8, %v105_v38, %v101_v40  ;;  %vm115_vm11 = vmor %vm113_vm10, %vm114_vm9 }
 0x11e   :  { %v107_v44 = vmul.f32 %v106_v43, %v65_v39  ;;  %v110_v45 = vsub.f32 1.0, %v109_v42 }
 0x120   :  { %v127_v47 = vadd.f32 %v286_v41, %v107_v44  ;;  %v111_v48 = vmul.f32 %v296_v37, %v110_v45 }
 0x122   :  { %201 = vmatmul.f32.vlgmr.msra.gmra.mxu0 %v127_v47  ;;  %224 = vmatmul.f32.vlgmr.msra.gmra.mxu1 %v127_v47  ;;  %v112_v50 = vadd.f32 %v296_v37, %v111_v48 }
 0x123   :  { %247 = vmatmul.f32.vlgmr.msra.gmra.mxu2 %v127_v47 }
 0x124   :  { %v116_v52 = vsel %vm115_vm11, %v296_v37, %v112_v50 }
 0x125   :  { %v121_v53 = vsel %vm118_vm12, %v120_v11, %v116_v52 }
 0x126   :  { %v122_v54 = vmul.f32 %v121_v53, %v66_v51 }
 0x128   :  { %v128_v55 = vadd.f32 %v286_v41, %v122_v54 }
 0x12a   :  { %204 = vmatmul.f32.vlgmr.msra.gmra.mxu3 %v128_v55  ;;  %227 = vmatmul.f32.gmra.mxu1 %v128_v55 }
 0x12b   :  { %250 = vmatmul.f32.gmra.mxu2 %v128_v55 }
 0x19f   :  { %v202_v59 = vpop.f32.mrf.mxu0  ;;  %v225_v60 = vpop.f32.mrf.mxu1 }
 0x1a0   :  { %v203_v61 = vadd.f32 %v202_v59, %v179_v57  ;;  %v226_v62 = vadd.f32 %v225_v60, %v180_v58 }
 0x1a2   :  { %254 = vst [vmem:[%s417_s5] sm:$0xff] %v203_v61 }
 0x1a3   :  { %255 = vst [vmem:[%s417_s5 + $0x8] sm:$0xff] %v226_v62 }
 0x1a6   :  { %v248_v63 = vpop.f32.mrf.mxu2 }
 0x1a7   :  { %v249_v0 = vadd.f32 %v248_v63, %v181_v15  ;;  %v228_v1 = vpop.f32.mrf.mxu1 }
 0x1a8   :  { %v229_v2 = vadd.f32 %v228_v1, %v180_v58 }
 0x1a9   :  { %256 = vst [vmem:[%s417_s5 + $0x10] sm:$0xff] %v249_v0 }
 0x1aa   :  { %258 = vst [vmem:[%s417_s5 + $0x20] sm:$0xff] %v229_v2 }
 0x1ad   :  { %v205_v3 = vpop.f32.mrf.mxu3 }
 0x1ae   :  { %v206_v4 = vadd.f32 %v205_v3, %v179_v57  ;;  %v251_v5 = vpop.f32.mrf.mxu2 }
 0x1af   :  { %v252_v6 = vadd.f32 %v251_v5, %v181_v15 }
 0x1b0   :  { %257 = vst [vmem:[%s417_s5 + $0x18] sm:$0xff] %v206_v4 }
 0x1b1   :  { %259 = vst [vmem:[%s417_s5 + $0x28] sm:$0xff] %v252_v6 }
 0x1b2   :  { %264 = vsyncpa [#allocation3], 1 }

// kernel: cross_attention_forward.12
= control target key start
LH: loop header
LB: loop body
LE: loop exit
PB: predicated region body
PF: predicated region fallthrough
CT: control target
= control target key end

     0   :  { %s183_s1 = inlined_call_operand.vmem [shape: f32[128,128], index: 1, kind: input, shape index: {}]   ;;  %s184_s2 = inlined_call_operand.vmem [shape: f32[1,128], index: 2, kind: input, shape index: {}]   ;;  %s185_s0 = inlined_call_operand.vmem [shape: f32[16,128], index: 0, kind: input, shape index: {}]   ;;  %s186_s3 = inlined_call_operand.vmem [shape: f32[16,128], index: 3, kind: input, shape index: {}]   ;;  %s187_s4 = inlined_call_operand.vmem [shape: f32[16,128], index: 4, kind: output, shape index: {}]  }
   0x1   :  { %v34_v0 = vld [vmem:[%s183_s1 + $0x78] sm:$0xff]  ;;  %v33_v1 = vld [vmem:[%s183_s1 + $0x70] sm:$0xff]  ;;  %v32_v2 = vld [vmem:[%s183_s1 + $0x68] sm:$0xff] }
   0x2   :  { %39 = vmatpush.msra.mxu0 %v34_v0  ;;  %72 = vmatpush.msra.mxu1 %v34_v0  ;;  %v31_v3 = vld [vmem:[%s183_s1 + $0x60] sm:$0xff]  ;;  %v30_v4 = vld [vmem:[%s183_s1 + $0x58] sm:$0xff]  ;;  %v29_v5 = vld [vmem:[%s183_s1 + $0x50] sm:$0xff] }
   0x3   :  { %v28_v6 = vld [vmem:[%s183_s1 + $0x48] sm:$0xff]  ;;  %v27_v7 = vld [vmem:[%s183_s1 + $0x40] sm:$0xff]  ;;  %v26_v8 = vld [vmem:[%s183_s1 + $0x38] sm:$0xff] }
   0x4   :  { %40 = vmatpush.msra.mxu0 %v33_v1  ;;  %73 = vmatpush.msra.mxu1 %v33_v1  ;;  %v25_v9 = vld [vmem:[%s183_s1 + $0x30] sm:$0xff]  ;;  %v24_v10 = vld [vmem:[%s183_s1 + $0x28] sm:$0xff]  ;;  %v23_v11 = vld [vmem:[%s183_s1 + $0x20] sm:$0xff] }
   0x5   :  { %v22_v12 = vld [vmem:[%s183_s1 + $0x18] sm:$0xff]  ;;  %v21_v13 = vld [vmem:[%s183_s1 + $0x10] sm:$0xff]  ;;  %v20_v14 = vld [vmem:[%s183_s1 + $0x8] sm:$0xff] }
   0x6   :  { %41 = vmatpush.msra.mxu0 %v32_v2  ;;  %74 = vmatpush.msra.mxu1 %v32_v2  ;;  %v19_v15 = vld [vmem:[%s183_s1] sm:$0xff]  ;;  %v18_v17 = vld [vmem:[%s185_s0 + $0x8] sm:$0xff] }
   0x7   :  { %v17_v16 = vld [vmem:[%s185_s0] sm:$0xff]  ;;  %v63_v22 = vld [vmem:[%s186_s3 + $0x8] sm:$0xff] }
   0x8   :  { %42 = vmatpush.msra.mxu0 %v31_v3  ;;  %75 = vmatpush.msra.mxu1 %v31_v3  ;;  %v88_v18 = vld [vmem:[%s184_s2] ss:$0 sm:$0xff] }
   0x9   :  { %v62_v20 = vld [vmem:[%s186_s3] sm:$0xff] }
   0xa   :  { %43 = vmatpush.msra.mxu0 %v30_v4  ;;  %76 = vmatpush.msra.mxu1 %v30_v4 }
   0xc   :  { %44 = vmatpush.msra.mxu0 %v29_v5  ;;  %77 = vmatpush.msra.mxu1 %v29_v5 }
   0xe   :  { %45 = vmatpush.msra.mxu0 %v28_v6  ;;  %78 = vmatpush.msra.mxu1 %v28_v6 }
  0x10   :  { %46 = vmatpush.msra.mxu0 %v27_v7  ;;  %79 = vmatpush.msra.mxu1 %v27_v7 }
  0x12   :  { %47 = vmatpush.msra.mxu0 %v26_v8  ;;  %80 = vmatpush.msra.mxu1 %v26_v8 }
  0x14   :  { %48 = vmatpush.msra.mxu0 %v25_v9  ;;  %81 = vmatpush.msra.mxu1 %v25_v9 }
  0x16   :  { %49 = vmatpush.msra.mxu0 %v24_v10  ;;  %82 = vmatpush.msra.mxu1 %v24_v10 }
  0x18   :  { %50 = vmatpush.msra.mxu0 %v23_v11  ;;  %83 = vmatpush.msra.mxu1 %v23_v11 }
  0x1a   :  { %51 = vmatpush.msra.mxu0 %v22_v12  ;;  %84 = vmatpush.msra.mxu1 %v22_v12 }
  0x1c   :  { %52 = vmatpush.msra.mxu0 %v21_v13  ;;  %85 = vmatpush.msra.mxu1 %v21_v13 }
  0x1e   :  { %53 = vmatpush.msra.mxu0 %v20_v14  ;;  %86 = vmatpush.msra.mxu1 %v20_v14 }
  0x20   :  { %54 = vmatpush.msra.mxu0 %v19_v15  ;;  %87 = vmatpush.msra.mxu1 %v19_v15 }
  0x21   :  { %55 = vmatmul.f32.vlgmr.msra.gmra.mxu0 %v17_v16  ;;  %58 = vmatmul.f32.vlgmr.msra.gmra.mxu1 %v18_v17 }
  0x9e   :  { %v56_v19 = vpop.f32.mrf.mxu0  ;;  %v59_v21 = vpop.f32.mrf.mxu1 }
  0x9f   :  { %v57_v23 = vadd.f32 %v88_v18, %v56_v19  ;;  %v60_v24 = vadd.f32 %v88_v18, %v59_v21 }
  0xa1   :  { %v64_v25 = vadd.f32 %v62_v20, %v57_v23  ;;  %v65_v26 = vadd.f32 %v63_v22, %v60_v24 }
  0xa3   :  { %66 = vst [vmem:[%s187_s4] sm:$0xff] %v64_v25 }
  0xa4   :  { %67 = vst [vmem:[%s187_s4 + $0x8] sm:$0xff] %v65_v26 }

// kernel: cross_attention_forward.11
= control target key start
LH: loop header
LB: loop body
LE: loop exit
PB: predicated region body
PF: predicated region fallthrough
CT: control target
= control target key end

     0   :  { %s749_s15 = smov 0   ;;  %s817_s0 = inlined_call_operand.vmem [shape: f32[2,4,8,32], index: 0, kind: input, shape index: {}]   ;;  %s818_s1 = inlined_call_operand.vmem [shape: f32[2,4,8,32], index: 1, kind: input, shape index: {}]   ;;  %s819_s2 = inlined_call_operand.vmem [shape: f32[2,4,8,32], index: 2, kind: input, shape index: {}]   ;;  %s820_s3 = inlined_call_operand.vmem [shape: f32[2,1,8], index: 3, kind: input, shape index: {}]   ;;  %s821_s4 = inlined_call_operand.vmem [shape: f32[2,4,8,32], index: 4, kind: output, shape index: {}]  }
   0x1 LB: > { %s659_s16 = sadd.s32 4294967295, %s721_s15   ;;  %p663_p0 = scmp.ge.s32.totalorder %s721_s15, 1  ;;  %s721_s15 = sphi %s749_s15, %s14_s15  }
   0x2   : > { %p190_p1 = scmp.lt.s32.totalorder %s721_s15, 3 }
   0x4   : > { %p191_p2 = pnand %p663_p0, %p190_p1 }
   0x5   : > { %p229_p3 = scmp.lt.s32.totalorder (!%p191_p2), %s659_s16, 1 }
   0x6   : > { %194 = sbr.rel (%p191_p2) target bundleno = 556 (0x22c), region = 36 }
   0xb   : > { %s823_s16 = smov (!%p229_p3, %s659_s16), 1  ;;  %vm265_vm0 = vcmask 261120   ;;  %v723_v9 = vmov 0   ;;  %vm378_vm3 = vcmask 64512  }
   0xc   : > { %s757_s17 = sshll.u32 %s823_s16, 5  ;;  %s246_s26 = scalar_lea.vmem %s820_s3, %s823_s16 }
   0xd   : > { %s238_s20 = scalar_lea.vmem %s818_s1, %s757_s17  ;;  %s233_s23 = scalar_lea.vmem %s817_s0, %s757_s17  ;;  %v264_v8 = vld [vmem:[%s246_s26] sm:$0x1] }
   0xe   : > { %v256_v0 = vld [vmem:[%s238_s20] sm:$0xff]  ;;  %v258_v1 = vld [vmem:[%s238_s20 + $0x10] sm:$0xff]  ;;  %v257_v4 = vld [vmem:[%s238_s20 + $0x8] sm:$0xff]  ;;  %vm370_vm1 = vcmp.gt.f32.partialorder %v264_v8, 0.0  ;;  %s243_s29 = scalar_lea.vmem %s819_s2, %s757_s17  ;;  %s251_s6 = scalar_lea.vmem %s821_s4, %s757_s17 }
   0xf   : > { %v252_v2 = vld [vmem:[%s233_s23] sm:$0xff]  ;;  %672 = vmatpush.xpose.msk.msra.mxu0 %vm265_vm0, %v256_v0  ;;  %676 = vmatpush.xpose.msk.msra.mxu2 %vm265_vm0, %v258_v1  ;;  %v254_v3 = vld [vmem:[%s233_s23 + $0x10] sm:$0xff]  ;;  %v259_v5 = vld [vmem:[%s238_s20 + $0x18] sm:$0xff]  ;;  %v371_v10 = vsel %vm370_vm1, 1, %v723_v9 }
  0x10   : > { %674 = vmatpush.xpose.msk.msra.mxu1 %vm265_vm0, %v257_v4  ;;  %678 = vmatpush.xpose.msk.msra.mxu3 %vm265_vm0, %v259_v5  ;;  %v253_v6 = vld [vmem:[%s233_s23 + $0x8] sm:$0xff]  ;;  %v255_v7 = vld [vmem:[%s233_s23 + $0x18] sm:$0xff]  ;;  %v372_v11 = vperm.slane %v371_v10, 0  ;;  %v260_v44 = vld [vmem:[%s243_s29] sm:$0xff] }
  0x11   : > { %v262_v45 = vld [vmem:[%s243_s29 + $0x10] sm:$0xff]  ;;  %v261_v46 = vld [vmem:[%s243_s29 + $0x8] sm:$0xff]  ;;  %v263_v47 = vld [vmem:[%s243_s29 + $0x18] sm:$0xff] }
  0x12   : > { %673 = vmatmul.msk.f32.vlgmr.msra.gmra.mxu0 %vm265_vm0, %v252_v2  ;;  %677 = vmatmul.msk.f32.vlgmr.msra.gmra.mxu2 %vm265_vm0, %v254_v3  ;;  %vm373_vm2 = vcmp.eq.s32.totalorder %v372_v11, 1 }
  0x13   : > { %675 = vmatmul.msk.f32.vlgmr.msra.gmra.mxu1 %vm265_vm0, %v253_v6  ;;  %679 = vmatmul.msk.f32.vlgmr.msra.gmra.mxu3 %vm265_vm0, %v255_v7 }
  0x14   : > { %493 = vmatpush.msrb.mxu0 %v260_v44  ;;  %539 = vmatpush.msrb.mxu2 %v262_v45 }
  0x15   : > { %516 = vmatpush.msrb.mxu1 %v261_v46  ;;  %562 = vmatpush.msrb.mxu3 %v263_v47 }
  0x8f   : > { %v289_v12 = vpop.f32.mrf.mxu0 }
  0x90   : > { %v374_v13 = vsel %vm373_vm2, %v289_v12, -1e+09  ;;  %v315_v15 = vpop.f32.mrf.mxu1 }
  0x91   : > { %v379_v14 = vsel %vm378_vm3, %v374_v13, -inf  ;;  %v375_v16 = vsel %vm373_vm2, %v315_v15, -1e+09 }
  0x92   : > { %380 = vmax.xlane.f32.xlu1 %v379_v14  ;;  %v382_v20 = vsel %vm378_vm3, %v375_v16, -inf }
  0x95   : > { %v341_v17 = vpop.f32.mrf.mxu2 }
  0x96   : > { %v376_v18 = vsel %vm373_vm2, %v341_v17, -1e+09  ;;  %v367_v21 = vpop.f32.mrf.mxu3 }
  0x97   : > { %v385_v19 = vsel %vm378_vm3, %v376_v18, -inf  ;;  %v377_v22 = vsel %vm373_vm2, %v367_v21, -1e+09 }
  0x98   : > { %386 = vmax.xlane.f32.xlu0 %v385_v19  ;;  %v388_v23 = vsel %vm378_vm3, %v377_v22, -inf }
  0x9a   : > { %383 = vmax.xlane.f32.xlu1 %v382_v20 }
  0xa0   : > { %389 = vmax.xlane.f32.xlu0 %v388_v23 }
 0x105   : > { %v381_v24 = vpop.xlane.xlu1 %380 }
 0x106   : > { %v391_v25 = vsub.f32 %v374_v13, %v381_v24 }
 0x108   : > { %v395_v26 = vmul.f32 1.442695, %v391_v25 }
 0x10a   : > { %699 = vpow2.f32 %v395_v26 }
 0x10b   : > { %v387_v27 = vpop.xlane.xlu0 %386 }
 0x10c   : > { %v393_v28 = vsub.f32 %v376_v18, %v387_v27 }
 0x10d   : > { %v384_v29 = vpop.xlane.xlu1 %383 }
 0x10e   : > { %v399_v30 = vmul.f32 1.442695, %v393_v28  ;;  %v392_v31 = vsub.f32 %v375_v16, %v384_v29 }
 0x110   : > { %v700_v32 = vpop.eup %699  ;;  %701 = vpow2.f32 %v399_v30  ;;  %v397_v33 = vmul.f32 1.442695, %v392_v31 }
 0x111   : > { %v403_v34 = vsel %vm378_vm3, %v700_v32, 0.0 }
 0x112   : > { %703 = vpow2.f32 %v397_v33  ;;  %404 = vadd.xlane.f32.xlu0 %v403_v34 }
 0x113   : > { %v390_v35 = vpop.xlane.xlu0 %389 }
 0x114   : > { %v394_v36 = vsub.f32 %v377_v22, %v390_v35 }
 0x116   : > { %v783_v37 = vpop.eup %701  ;;  %v401_v38 = vmul.f32 1.442695, %v394_v36 }
 0x117   : > { %v409_v39 = vsel %vm378_vm3, %v783_v37, 0.0 }
 0x118   : > { %v787_v40 = vpop.eup %703  ;;  %705 = vpow2.f32 %v401_v38  ;;  %410 = vadd.xlane.f32.xlu2 %v409_v39 }
 0x119   : > { %v406_v41 = vsel %vm378_vm3, %v787_v40, 0.0 }
 0x11a   : > { %407 = vadd.xlane.f32.xlu1 %v406_v41 }
 0x11e   : > { %v791_v42 = vpop.eup %705 }
 0x11f   : > { %v412_v43 = vsel %vm378_vm3, %v791_v42, 0.0 }
 0x120   : > { %413 = vadd.xlane.f32.xlu2 %v412_v43 }
 0x185   : > { %v405_v48 = vpop.xlane.xlu0 %404 }
 0x186   : > { %707 = vrcp.f32 %v405_v48  ;;  %v426_v54 = vand.u32 2147483648, %v405_v48  ;;  %v424_v56 = vand.u32 2147483647, %v405_v48  ;;  %vm420_vm5 = vweird.f32 %v405_v48 }
 0x188   : > { %v427_v62 = vor.u32 1.1754944e-38, %v426_v54  ;;  %vm425_vm7 = vcmp.eq.f32.partialorder %v424_v56, 8.507059e+37 }
 0x18b   : > { %v411_v49 = vpop.xlane.xlu2 %410 }
 0x18c   : > { %v708_v50 = vpop.eup %707  ;;  %709 = vrcp.f32 %v411_v49  ;;  %v454_v2 = vand.u32 2147483647, %v411_v49  ;;  %v456_v3 = vand.u32 2147483648, %v411_v49  ;;  %vm450_vm9 = vweird.f32 %v411_v49 }
 0x18d   : > { %v416_v51 = vmul.f32 %v708_v50, %v405_v48  ;;  %v408_v52 = vpop.xlane.xlu1 %407  ;;  %vm421_vm4 = vweird.f32 %v708_v50 }
 0x18e   : > { %711 = vrcp.f32 %v408_v52  ;;  %vm422_vm6 = vmor %vm420_vm5, %vm421_vm4  ;;  %v441_v8 = vand.u32 2147483648, %v408_v52  ;;  %v439_v11 = vand.u32 2147483647, %v408_v52  ;;  %vm455_vm12 = vcmp.eq.f32.partialorder %v454_v2, 8.507059e+37 }
 0x18f   : > { %v417_v53 = vsub.f32 1.0, %v416_v51  ;;  %v457_v13 = vor.u32 1.1754944e-38, %v456_v3  ;;  %vm435_vm13 = vweird.f32 %v408_v52 }
 0x190   : > { %v442_v17 = vor.u32 1.1754944e-38, %v441_v8  ;;  %vm440_vm15 = vcmp.eq.f32.partialorder %v439_v11, 8.507059e+37 }
 0x191   : > { %v418_v55 = vmul.f32 %v708_v50, %v417_v53 }
 0x192   : > { %v710_v57 = vpop.eup %709 }
 0x193   : > { %v419_v58 = vadd.f32 %v708_v50, %v418_v55  ;;  %v446_v59 = vmul.f32 %v710_v57, %v411_v49  ;;  %v414_v60 = vpop.xlane.xlu2 %413  ;;  %vm451_vm8 = vweird.f32 %v710_v57 }
 0x194   : > { %v712_v61 = vpop.eup %711  ;;  %713 = vrcp.f32 %v414_v60  ;;  %vm452_vm11 = vmor %vm450_vm9, %vm451_vm8  ;;  %v471_v22 = vand.u32 2147483648, %v414_v60  ;;  %v469_v25 = vand.u32 2147483647, %v414_v60  ;;  %vm465_vm2 = vweird.f32 %v414_v60 }
 0x195   : > { %v423_v63 = vsel %vm422_vm6, %v708_v50, %v419_v58  ;;  %v447_v0 = vsub.f32 1.0, %v446_v59  ;;  %v431_v1 = vmul.f32 %v712_v61, %v408_v52  ;;  %vm436_vm10 = vweird.f32 %v712_v61 }
 0x196   : > { %v428_v4 = vsel %vm425_vm7, %v427_v62, %v423_v63  ;;  %vm437_vm14 = vmor %vm435_vm13, %vm436_vm10  ;;  %v472_v28 = vor.u32 1.1754944e-38, %v471_v22  ;;  %vm470_vm5 = vcmp.eq.f32.partialorder %v469_v25, 8.507059e+37 }
 0x197   : > { %v448_v5 = vmul.f32 %v710_v57, %v447_v0  ;;  %v432_v6 = vsub.f32 1.0, %v431_v1  ;;  %v429_v7 = vmul.f32 %v700_v32, %v428_v4 }
 0x199   : > { %v449_v9 = vadd.f32 %v710_v57, %v448_v5  ;;  %v433_v10 = vmul.f32 %v712_v61, %v432_v6  ;;  %680 = vmatmul.msk.f32.vlgmr.msrb.gmra.mxu0 %vm378_vm3, %v429_v7 }
 0x19a   : > { %v714_v12 = vpop.eup %713 }
 0x19b   : > { %v434_v14 = vadd.f32 %v712_v61, %v433_v10  ;;  %v461_v15 = vmul.f32 %v714_v12, %v414_v60  ;;  %v453_v16 = vsel %vm452_vm11, %v710_v57, %v449_v9  ;;  %vm466_vm1 = vweird.f32 %v714_v12 }
 0x19c   : > { %v458_v18 = vsel %vm455_vm12, %v457_v13, %v453_v16  ;;  %vm467_vm4 = vmor %vm465_vm2, %vm466_vm1 }
 0x19d   : > { %v438_v19 = vsel %vm437_vm14, %v712_v61, %v434_v14  ;;  %v462_v20 = vsub.f32 1.0, %v461_v15  ;;  %v459_v21 = vmul.f32 %v783_v37, %v458_v18 }
 0x19e   : > { %v443_v23 = vsel %vm440_vm15, %v442_v17, %v438_v19 }
 0x19f   : > { %v463_v24 = vmul.f32 %v714_v12, %v462_v20  ;;  %682 = vmatmul.msk.f32.vlgmr.msrb.gmra.mxu2 %vm378_vm3, %v459_v21  ;;  %v444_v26 = vmul.f32 %v787_v40, %v443_v23 }
 0x1a1   : > { %v464_v27 = vadd.f32 %v714_v12, %v463_v24  ;;  %681 = vmatmul.msk.f32.vlgmr.msrb.gmra.mxu1 %vm378_vm3, %v444_v26 }
 0x1a3   : > { %v468_v29 = vsel %vm467_vm4, %v714_v12, %v464_v27 }
 0x1a4   : > { %v473_v30 = vsel %vm470_vm5, %v472_v28, %v468_v29 }
 0x1a5   : > { %v474_v31 = vmul.f32 %v791_v42, %v473_v30 }
 0x1a7   : > { %683 = vmatmul.msk.f32.vlgmr.msrb.gmra.mxu3 %vm378_vm3, %v474_v31 }
 0x216   : > { %v495_v32 = vpop.f32.mrf.mxu0 }
 0x217   : > { %567 = vst.msk [vmem:[%s251_s6] sm:$0xff] %vm265_vm0, %v495_v32 }
 0x21e   : > { %v518_v33 = vpop.f32.mrf.mxu1 }
 0x21f   : > { %568 = vst.msk [vmem:[%s251_s6 + $0x8] sm:$0xff] %vm265_vm0, %v518_v33 }
 0x222   : > { %v541_v34 = vpop.f32.mrf.mxu2 }
 0x223   : > { %569 = vst.msk [vmem:[%s251_s6 + $0x10] sm:$0xff] %vm265_vm0, %v541_v34 }
 0x22a   : > { %v564_v35 = vpop.f32.mrf.mxu3 }
 0x22b   : > { %570 = vst.msk [vmem:[%s251_s6 + $0x18] sm:$0xff] %vm265_vm0, %v564_v35 }
 0x22c PF: > { %s14_s15 = sadd.s32 1, %s721_s15  }
 0x22d   : > { %p11_p4 = scmp.ge.s32.totalorder %s14_s15, 4  }
 0x22f   :  { %13 = sbr.rel (!%p11_p4) target bundleno = 1 (0x1), region = 75 }

// kernel: cross_attention_forward.13
= control target key start
LH: loop header
LB: loop body
LE: loop exit
PB: predicated region body
PF: predicated region fallthrough
CT: control target
= control target key end

     0   :  { %v192_v2 = vmov 128.0   ;;  %s302_s0 = inlined_call_operand.vmem [shape: f32[16,128], index: 0, kind: input, shape index: {}]   ;;  %s303_s1 = inlined_call_operand.vmem [shape: f32[1,128], index: 1, kind: input, shape index: {}]   ;;  %s304_s2 = inlined_call_operand.vmem [shape: f32[1,128], index: 2, kind: input, shape index: {}]   ;;  %s305_s4 = inlined_call_operand.vmem [shape: f32[1,128], index: 4, kind: input, shape index: {}]   ;;  %s306_s3 = inlined_call_operand.vmem [shape: f32[128,128], index: 3, kind: input, shape index: {}]   ;;  %s307_s5 = inlined_call_operand.vmem [shape: f32[16,128], index: 5, kind: output, shape index: {}]  }
   0x1   :  { %v20_v0 = vld [vmem:[%s302_s0] sm:$0xff]  ;;  %v21_v1 = vld [vmem:[%s302_s0 + $0x8] sm:$0xff]  ;;  %182 = vrcp.f32 %v192_v2  ;;  %v128_v17 = vld [vmem:[%s306_s3 + $0x78] sm:$0xff] }
   0x2   :  { %22 = vadd.xlane.f32.xlu0 %v20_v0  ;;  %133 = vmatpush.msra.mxu0 %v128_v17  ;;  %v127_v18 = vld [vmem:[%s306_s3 + $0x70] sm:$0xff]  ;;  %v126_v19 = vld [vmem:[%s306_s3 + $0x68] sm:$0xff]  ;;  %v125_v20 = vld [vmem:[%s306_s3 + $0x60] sm:$0xff] }
   0x3   :  { %162 = vmatpush.msra.mxu1 %v128_v17  ;;  %v124_v21 = vld [vmem:[%s306_s3 + $0x58] sm:$0xff]  ;;  %v123_v22 = vld [vmem:[%s306_s3 + $0x50] sm:$0xff]  ;;  %v122_v23 = vld [vmem:[%s306_s3 + $0x48] sm:$0xff] }
   0x4   :  { %134 = vmatpush.msra.mxu0 %v127_v18  ;;  %v121_v24 = vld [vmem:[%s306_s3 + $0x40] sm:$0xff]  ;;  %v120_v25 = vld [vmem:[%s306_s3 + $0x38] sm:$0xff]  ;;  %v119_v26 = vld [vmem:[%s306_s3 + $0x30] sm:$0xff] }
   0x5   :  { %163 = vmatpush.msra.mxu1 %v127_v18  ;;  %v118_v29 = vld [vmem:[%s306_s3 + $0x28] sm:$0xff]  ;;  %v117_v30 = vld [vmem:[%s306_s3 + $0x20] sm:$0xff]  ;;  %v116_v31 = vld [vmem:[%s306_s3 + $0x18] sm:$0xff] }
   0x6   :  { %135 = vmatpush.msra.mxu0 %v126_v19  ;;  %v115_v32 = vld [vmem:[%s306_s3 + $0x10] sm:$0xff]  ;;  %v114_v36 = vld [vmem:[%s306_s3 + $0x8] sm:$0xff]  ;;  %v113_v38 = vld [vmem:[%s306_s3] sm:$0xff] }
   0x7   :  { %v183_v3 = vpop.eup %182  ;;  %164 = vmatpush.msra.mxu1 %v126_v19  ;;  %v179_v63 = vld [vmem:[%s303_s1] ss:$0 sm:$0xff] }
   0x8   :  { %v27_v4 = vmul.f32 128.0, %v183_v3  ;;  %vm31_vm0 = vweird.f32 %v183_v3  ;;  %136 = vmatpush.msra.mxu0 %v125_v20 }
   0x9   :  { %165 = vmatpush.msra.mxu1 %v125_v20 }
   0xa   :  { %24 = vadd.xlane.f32.xlu0 %v21_v1  ;;  %v28_v5 = vsub.f32 1.0, %v27_v4  ;;  %137 = vmatpush.msra.mxu0 %v124_v21 }
   0xb   :  { %166 = vmatpush.msra.mxu1 %v124_v21 }
   0xc   :  { %v29_v6 = vmul.f32 %v183_v3, %v28_v5  ;;  %138 = vmatpush.msra.mxu0 %v123_v22 }
   0xd   :  { %167 = vmatpush.msra.mxu1 %v123_v22 }
   0xe   :  { %v30_v7 = vadd.f32 %v183_v3, %v29_v6  ;;  %139 = vmatpush.msra.mxu0 %v122_v23 }
   0xf   :  { %168 = vmatpush.msra.mxu1 %v122_v23 }
  0x10   :  { %v32_v8 = vsel %vm31_vm0, %v183_v3, %v30_v7  ;;  %140 = vmatpush.msra.mxu0 %v121_v24  ;;  %v180_v7 = vld [vmem:[%s304_s2] ss:$0 sm:$0xff] }
  0x11   :  { %169 = vmatpush.msra.mxu1 %v121_v24  ;;  %v181_v24 = vld [vmem:[%s305_s4] ss:$0 sm:$0xff] }
  0x12   :  { %141 = vmatpush.msra.mxu0 %v120_v25 }
  0x13   :  { %170 = vmatpush.msra.mxu1 %v120_v25 }
  0x14   :  { %142 = vmatpush.msra.mxu0 %v119_v26 }
  0x15   :  { %171 = vmatpush.msra.mxu1 %v119_v26 }
  0x16   :  { %143 = vmatpush.msra.mxu0 %v118_v29 }
  0x17   :  { %172 = vmatpush.msra.mxu1 %v118_v29 }
  0x18   :  { %144 = vmatpush.msra.mxu0 %v117_v30 }
  0x19   :  { %173 = vmatpush.msra.mxu1 %v117_v30 }
  0x1a   :  { %145 = vmatpush.msra.mxu0 %v116_v31 }
  0x1b   :  { %174 = vmatpush.msra.mxu1 %v116_v31 }
  0x1c   :  { %146 = vmatpush.msra.mxu0 %v115_v32 }
  0x1d   :  { %175 = vmatpush.msra.mxu1 %v115_v32 }
  0x1e   :  { %147 = vmatpush.msra.mxu0 %v114_v36 }
  0x1f   :  { %176 = vmatpush.msra.mxu1 %v114_v36 }
  0x20   :  { %148 = vmatpush.msra.mxu0 %v113_v38 }
  0x21   :  { %177 = vmatpush.msra.mxu1 %v113_v38 }
  0x75   :  { %v23_v9 = vpop.xlane.xlu0 %22 }
  0x76   :  { %v33_v10 = vmul.f32 %v32_v8, %v23_v9 }
  0x78   :  { %v229_v11 = vsub.f32 %v20_v0, %v33_v10 }
  0x7a   :  { %v37_v12 = vmul.f32 %v229_v11, %v229_v11  ;;  %v49_v5 = vmul.f32 %v179_v63, %v229_v11 }
  0x7c   :  { %39 = vadd.xlane.f32.xlu1 %v37_v12 }
  0x7d   :  { %v25_v13 = vpop.xlane.xlu0 %24 }
  0x7e   :  { %v34_v14 = vmul.f32 %v32_v8, %v25_v13 }
  0x80   :  { %v233_v15 = vsub.f32 %v21_v1, %v34_v14 }
  0x82   :  { %v38_v16 = vmul.f32 %v233_v15, %v233_v15  ;;  %v50_v19 = vmul.f32 %v179_v63, %v233_v15 }
  0x84   :  { %41 = vadd.xlane.f32.xlu1 %v38_v16 }
  0xef   :  { %v40_v27 = vpop.xlane.xlu1 %39 }
  0xf0   :  { %v43_v28 = vmul.f32 0.007874016, %v40_v27 }
  0xf2   :  { %184 = vrsqrt.f32 %v43_v28  ;;  %vm58_vm1 = vcmp.eq.f32.partialorder %v43_v28, inf  ;;  %v61_v47 = vand.u32 2147483648, %v43_v28  ;;  %vm60_vm2 = vcmp.eq.f32.partialorder %v43_v28, 0.0 }
  0xf7   :  { %v42_v33 = vpop.xlane.xlu1 %41 }
  0xf8   :  { %v185_v34 = vpop.eup %184  ;;  %v44_v35 = vmul.f32 0.007874016, %v42_v33 }
  0xf9   :  { %v52_v37 = vmul.f32 %v185_v34, %v43_v28 }
  0xfa   :  { %186 = vrsqrt.f32 %v44_v35  ;;  %vm70_vm3 = vcmp.eq.f32.partialorder %v44_v35, inf  ;;  %v73_v55 = vand.u32 2147483648, %v44_v35  ;;  %vm72_vm4 = vcmp.eq.f32.partialorder %v44_v35, 0.0 }
  0xfb   :  { %v53_v39 = vmul.f32 %v185_v34, %v52_v37 }
  0xfd   :  { %v54_v40 = vmul.f32 0.5, %v53_v39 }
  0xff   :  { %v55_v41 = vsub.f32 1.5, %v54_v40 }
 0x100   :  { %v187_v42 = vpop.eup %186 }
 0x101   :  { %v56_v43 = vmul.f32 %v185_v34, %v55_v41  ;;  %v64_v44 = vmul.f32 %v187_v42, %v44_v35 }
 0x103   :  { %v57_v45 = vmul.f32 %v56_v43, %v43_v28  ;;  %v65_v46 = vmul.f32 %v187_v42, %v64_v44 }
 0x105   :  { %v66_v48 = vmul.f32 0.5, %v65_v46  ;;  %v59_v49 = vsel %vm58_vm1, %v43_v28, %v57_v45 }
 0x106   :  { %v62_v50 = vsel %vm60_vm2, %v61_v47, %v59_v49 }
 0x107   :  { %v67_v51 = vsub.f32 1.5, %v66_v48  ;;  %v75_v52 = vadd.f32 1e-06, %v62_v50 }
 0x109   :  { %v68_v53 = vmul.f32 %v187_v42, %v67_v51  ;;  %188 = vrcp.f32 %v75_v52  ;;  %v88_v62 = vand.u32 2147483648, %v75_v52  ;;  %v86_v1 = vand.u32 2147483647, %v75_v52 }
 0x10a   :  { %vm82_vm6 = vweird.f32 %v75_v52 }
 0x10b   :  { %v69_v54 = vmul.f32 %v68_v53, %v44_v35  ;;  %v89_v4 = vor.u32 1.1754944e-38, %v88_v62  ;;  %vm87_vm8 = vcmp.eq.f32.partialorder %v86_v1, 8.507059e+37 }
 0x10d   :  { %v71_v56 = vsel %vm70_vm3, %v44_v35, %v69_v54 }
 0x10e   :  { %v74_v57 = vsel %vm72_vm4, %v73_v55, %v71_v56 }
 0x10f   :  { %v189_v58 = vpop.eup %188  ;;  %v76_v59 = vadd.f32 1e-06, %v74_v57 }
 0x110   :  { %v78_v60 = vmul.f32 %v189_v58, %v75_v52  ;;  %vm83_vm5 = vweird.f32 %v189_v58 }
 0x111   :  { %190 = vrcp.f32 %v76_v59  ;;  %vm84_vm7 = vmor %vm82_vm6, %vm83_vm5  ;;  %v103_v13 = vand.u32 2147483648, %v76_v59  ;;  %v101_v17 = vand.u32 2147483647, %v76_v59  ;;  %vm97_vm10 = vweird.f32 %v76_v59 }
 0x112   :  { %v79_v61 = vsub.f32 1.0, %v78_v60 }
 0x113   :  { %v104_v11 = vor.u32 1.1754944e-38, %v103_v13  ;;  %vm102_vm12 = vcmp.eq.f32.partialorder %v101_v17, 8.507059e+37 }
 0x114   :  { %v80_v0 = vmul.f32 %v189_v58, %v79_v61 }
 0x116   :  { %v81_v2 = vadd.f32 %v189_v58, %v80_v0 }
 0x117   :  { %v191_v3 = vpop.eup %190 }
 0x118   :  { %v85_v6 = vsel %vm84_vm7, %v189_v58, %v81_v2  ;;  %v93_v8 = vmul.f32 %v191_v3, %v76_v59  ;;  %vm98_vm9 = vweird.f32 %v191_v3 }
 0x119   :  { %v90_v9 = vsel %vm87_vm8, %v89_v4, %v85_v6  ;;  %vm99_vm11 = vmor %vm97_vm10, %vm98_vm9 }
 0x11a   :  { %v91_v10 = vmul.f32 %v90_v9, %v49_v5  ;;  %v94_v12 = vsub.f32 1.0, %v93_v8 }
 0x11c   :  { %v111_v14 = vadd.f32 %v180_v7, %v91_v10  ;;  %v95_v16 = vmul.f32 %v191_v3, %v94_v12 }
 0x11e   :  { %149 = vmatmul.f32.vlgmr.msra.gmra.mxu0 %v111_v14  ;;  %v96_v18 = vadd.f32 %v191_v3, %v95_v16 }
 0x120   :  { %v100_v20 = vsel %vm99_vm11, %v191_v3, %v96_v18 }
 0x121   :  { %v105_v21 = vsel %vm102_vm12, %v104_v11, %v100_v20 }
 0x122   :  { %v106_v22 = vmul.f32 %v105_v21, %v50_v19 }
 0x124   :  { %v112_v23 = vadd.f32 %v180_v7, %v106_v22 }
 0x126   :  { %152 = vmatmul.f32.vlgmr.msra.gmra.mxu1 %v112_v23 }
 0x19b   :  { %v150_v25 = vpop.f32.mrf.mxu0 }
 0x19c   :  { %v151_v26 = vadd.f32 %v181_v24, %v150_v25 }
 0x19e   :  { %156 = vst [vmem:[%s307_s5] sm:$0xff] %v151_v26 }
 0x1a3   :  { %v153_v27 = vpop.f32.mrf.mxu1 }
 0x1a4   :  { %v154_v28 = vadd.f32 %v181_v24, %v153_v27 }
 0x1a6   :  { %157 = vst [vmem:[%s307_s5 + $0x8] sm:$0xff] %v154_v28 }

// kernel: cross_attention_forward.14
= control target key start
LH: loop header
LB: loop body
LE: loop exit
PB: predicated region body
PF: predicated region fallthrough
CT: control target
= control target key end

     0   :  { %s277_s1 = inlined_call_operand.vmem [shape: f32[128,256], index: 1, kind: input, shape index: {}]   ;;  %s278_s0 = inlined_call_operand.vmem [shape: f32[16,128], index: 0, kind: input, shape index: {}]   ;;  %s279_s2 = inlined_call_operand.vmem [shape: f32[1,256], index: 2, kind: input, shape index: {}]   ;;  %s280_s3 = inlined_call_operand.vmem [shape: f32[16,256], index: 3, kind: output, shape index: {}]  }
   0x1   :  { %v46_v0 = vld [vmem:[%s277_s1 + $0xf0] sm:$0xff]  ;;  %v47_v1 = vld [vmem:[%s277_s1 + $0xf8] sm:$0xff]  ;;  %v44_v2 = vld [vmem:[%s277_s1 + $0xe0] sm:$0xff] }
   0x2   :  { %108 = vmatpush.msra.mxu2 %v46_v0  ;;  %124 = vmatpush.msra.mxu3 %v47_v1  ;;  %v45_v3 = vld [vmem:[%s277_s1 + $0xe8] sm:$0xff]  ;;  %v42_v4 = vld [vmem:[%s277_s1 + $0xd0] sm:$0xff]  ;;  %v43_v5 = vld [vmem:[%s277_s1 + $0xd8] sm:$0xff] }
   0x3   :  { %54 = vmatpush.msra.mxu0 %v46_v0  ;;  %77 = vmatpush.msra.mxu1 %v47_v1  ;;  %v40_v6 = vld [vmem:[%s277_s1 + $0xc0] sm:$0xff]  ;;  %v41_v7 = vld [vmem:[%s277_s1 + $0xc8] sm:$0xff]  ;;  %v38_v8 = vld [vmem:[%s277_s1 + $0xb0] sm:$0xff] }
   0x4   :  { %109 = vmatpush.msra.mxu2 %v44_v2  ;;  %125 = vmatpush.msra.mxu3 %v45_v3  ;;  %v39_v9 = vld [vmem:[%s277_s1 + $0xb8] sm:$0xff]  ;;  %v36_v10 = vld [vmem:[%s277_s1 + $0xa0] sm:$0xff]  ;;  %v37_v11 = vld [vmem:[%s277_s1 + $0xa8] sm:$0xff] }
   0x5   :  { %55 = vmatpush.msra.mxu0 %v44_v2  ;;  %78 = vmatpush.msra.mxu1 %v45_v3  ;;  %v34_v12 = vld [vmem:[%s277_s1 + $0x90] sm:$0xff]  ;;  %v35_v13 = vld [vmem:[%s277_s1 + $0x98] sm:$0xff]  ;;  %v32_v14 = vld [vmem:[%s277_s1 + $0x80] sm:$0xff] }
   0x6   :  { %110 = vmatpush.msra.mxu2 %v42_v4  ;;  %126 = vmatpush.msra.mxu3 %v43_v5  ;;  %v33_v15 = vld [vmem:[%s277_s1 + $0x88] sm:$0xff]  ;;  %v30_v16 = vld [vmem:[%s277_s1 + $0x70] sm:$0xff]  ;;  %v31_v17 = vld [vmem:[%s277_s1 + $0x78] sm:$0xff] }
   0x7   :  { %56 = vmatpush.msra.mxu0 %v42_v4  ;;  %79 = vmatpush.msra.mxu1 %v43_v5  ;;  %v28_v18 = vld [vmem:[%s277_s1 + $0x60] sm:$0xff]  ;;  %v29_v19 = vld [vmem:[%s277_s1 + $0x68] sm:$0xff]  ;;  %v26_v20 = vld [vmem:[%s277_s1 + $0x50] sm:$0xff] }
   0x8   :  { %111 = vmatpush.msra.mxu2 %v40_v6  ;;  %127 = vmatpush.msra.mxu3 %v41_v7  ;;  %v27_v21 = vld [vmem:[%s277_s1 + $0x58] sm:$0xff]  ;;  %v24_v22 = vld [vmem:[%s277_s1 + $0x40] sm:$0xff]  ;;  %v25_v23 = vld [vmem:[%s277_s1 + $0x48] sm:$0xff] }
   0x9   :  { %57 = vmatpush.msra.mxu0 %v40_v6  ;;  %80 = vmatpush.msra.mxu1 %v41_v7  ;;  %v22_v24 = vld [vmem:[%s277_s1 + $0x30] sm:$0xff]  ;;  %v23_v25 = vld [vmem:[%s277_s1 + $0x38] sm:$0xff]  ;;  %v20_v26 = vld [vmem:[%s277_s1 + $0x20] sm:$0xff] }
   0xa   :  { %112 = vmatpush.msra.mxu2 %v38_v8  ;;  %128 = vmatpush.msra.mxu3 %v39_v9  ;;  %v21_v27 = vld [vmem:[%s277_s1 + $0x28] sm:$0xff]  ;;  %v18_v28 = vld [vmem:[%s277_s1 + $0x10] sm:$0xff]  ;;  %v19_v29 = vld [vmem:[%s277_s1 + $0x18] sm:$0xff] }
   0xb   :  { %58 = vmatpush.msra.mxu0 %v38_v8  ;;  %81 = vmatpush.msra.mxu1 %v39_v9  ;;  %v16_v30 = vld [vmem:[%s277_s1] sm:$0xff]  ;;  %v17_v31 = vld [vmem:[%s277_s1 + $0x8] sm:$0xff] }
   0xc   :  { %113 = vmatpush.msra.mxu2 %v36_v10  ;;  %129 = vmatpush.msra.mxu3 %v37_v11  ;;  %v15_v32 = vld [vmem:[%s278_s0 + $0x8] sm:$0xff]  ;;  %v14_v33 = vld [vmem:[%s278_s0] sm:$0xff] }
   0xd   :  { %59 = vmatpush.msra.mxu0 %v36_v10  ;;  %82 = vmatpush.msra.mxu1 %v37_v11  ;;  %v48_v34 = vld [vmem:[%s279_s2] sm:$0x3] }
   0xe   :  { %114 = vmatpush.msra.mxu2 %v34_v12  ;;  %130 = vmatpush.msra.mxu3 %v35_v13  ;;  %v50_v35 = vperm.slane %v48_v34, 0  ;;  %v51_v36 = vperm.slane %v48_v34, 1 }
   0xf   :  { %60 = vmatpush.msra.mxu0 %v34_v12  ;;  %83 = vmatpush.msra.mxu1 %v35_v13 }
  0x10   :  { %115 = vmatpush.msra.mxu2 %v32_v14  ;;  %131 = vmatpush.msra.mxu3 %v33_v15 }
  0x11   :  { %61 = vmatpush.msra.mxu0 %v32_v14  ;;  %84 = vmatpush.msra.mxu1 %v33_v15 }
  0x12   :  { %116 = vmatpush.msra.mxu2 %v30_v16  ;;  %132 = vmatpush.msra.mxu3 %v31_v17 }
  0x13   :  { %62 = vmatpush.msra.mxu0 %v30_v16  ;;  %85 = vmatpush.msra.mxu1 %v31_v17 }
  0x14   :  { %117 = vmatpush.msra.mxu2 %v28_v18  ;;  %133 = vmatpush.msra.mxu3 %v29_v19 }
  0x15   :  { %63 = vmatpush.msra.mxu0 %v28_v18  ;;  %86 = vmatpush.msra.mxu1 %v29_v19 }
  0x16   :  { %118 = vmatpush.msra.mxu2 %v26_v20  ;;  %134 = vmatpush.msra.mxu3 %v27_v21 }
  0x17   :  { %64 = vmatpush.msra.mxu0 %v26_v20  ;;  %87 = vmatpush.msra.mxu1 %v27_v21 }
  0x18   :  { %119 = vmatpush.msra.mxu2 %v24_v22  ;;  %135 = vmatpush.msra.mxu3 %v25_v23 }
  0x19   :  { %65 = vmatpush.msra.mxu0 %v24_v22  ;;  %88 = vmatpush.msra.mxu1 %v25_v23 }
  0x1a   :  { %120 = vmatpush.msra.mxu2 %v22_v24  ;;  %136 = vmatpush.msra.mxu3 %v23_v25 }
  0x1b   :  { %66 = vmatpush.msra.mxu0 %v22_v24  ;;  %89 = vmatpush.msra.mxu1 %v23_v25 }
  0x1c   :  { %121 = vmatpush.msra.mxu2 %v20_v26  ;;  %137 = vmatpush.msra.mxu3 %v21_v27 }
  0x1d   :  { %67 = vmatpush.msra.mxu0 %v20_v26  ;;  %90 = vmatpush.msra.mxu1 %v21_v27 }
  0x1e   :  { %122 = vmatpush.msra.mxu2 %v18_v28  ;;  %138 = vmatpush.msra.mxu3 %v19_v29 }
  0x1f   :  { %68 = vmatpush.msra.mxu0 %v18_v28  ;;  %91 = vmatpush.msra.mxu1 %v19_v29 }
  0x20   :  { %123 = vmatpush.msra.mxu2 %v16_v30  ;;  %139 = vmatpush.msra.mxu3 %v17_v31 }
  0x21   :  { %73 = vmatmul.f32.vlgmr.msra.gmra.mxu2 %v15_v32  ;;  %96 = vmatmul.f32.vlgmr.msra.gmra.mxu3 %v15_v32 }
  0x22   :  { %69 = vmatpush.msra.mxu0 %v16_v30  ;;  %92 = vmatpush.msra.mxu1 %v17_v31 }
  0x23   :  { %70 = vmatmul.f32.vlgmr.msra.gmra.mxu0 %v14_v33  ;;  %93 = vmatmul.f32.vlgmr.msra.gmra.mxu1 %v14_v33 }
  0xa0   :  { %v71_v37 = vpop.f32.mrf.mxu0  ;;  %v94_v38 = vpop.f32.mrf.mxu1 }
  0xa1   :  { %v72_v39 = vadd.f32 %v71_v37, %v50_v35  ;;  %v95_v40 = vadd.f32 %v94_v38, %v51_v36 }
  0xa3   :  { %100 = vst [vmem:[%s280_s3] sm:$0xff] %v72_v39 }
  0xa4   :  { %v74_v41 = vpop.f32.mrf.mxu2  ;;  %101 = vst [vmem:[%s280_s3 + $0x8] sm:$0xff] %v95_v40  ;;  %v97_v42 = vpop.f32.mrf.mxu3 }
  0xa5   :  { %v75_v43 = vadd.f32 %v74_v41, %v50_v35  ;;  %v98_v44 = vadd.f32 %v97_v42, %v51_v36 }
  0xa7   :  { %102 = vst [vmem:[%s280_s3 + $0x10] sm:$0xff] %v75_v43 }
  0xa8   :  { %103 = vst [vmem:[%s280_s3 + $0x18] sm:$0xff] %v98_v44 }

// kernel: cross_attention_forward.18
= control target key start
LH: loop header
LB: loop body
LE: loop exit
PB: predicated region body
PF: predicated region fallthrough
CT: control target
= control target key end

     0   :  { %s294_s1 = inlined_call_operand.vmem [shape: f32[256,128], index: 1, kind: input, shape index: {}]   ;;  %s295_s2 = inlined_call_operand.vmem [shape: f32[1,128], index: 2, kind: input, shape index: {}]   ;;  %s296_s0 = inlined_call_operand.vmem [shape: f32[16,256], index: 0, kind: input, shape index: {}]   ;;  %s297_s3 = inlined_call_operand.vmem [shape: f32[16,128], index: 3, kind: input, shape index: {}]   ;;  %s298_s4 = inlined_call_operand.vmem [shape: f32[16,128], index: 4, kind: output, shape index: {}]  }
   0x1   :  { %v36_v0 = vld [vmem:[%s294_s1 + $0x78] sm:$0xff]  ;;  %v35_v1 = vld [vmem:[%s294_s1 + $0x70] sm:$0xff]  ;;  %v34_v4 = vld [vmem:[%s294_s1 + $0x68] sm:$0xff] }
   0x2   :  { %v52_v2 = vld [vmem:[%s294_s1 + $0xf8] sm:$0xff]  ;;  %113 = vmatpush.msra.mxu2 %v36_v0  ;;  %v51_v3 = vld [vmem:[%s294_s1 + $0xf0] sm:$0xff]  ;;  %57 = vmatpush.msra.mxu0 %v36_v0  ;;  %v50_v5 = vld [vmem:[%s294_s1 + $0xe8] sm:$0xff] }
   0x3   :  { %129 = vmatpush.msra.mxu3 %v52_v2  ;;  %80 = vmatpush.msra.mxu1 %v52_v2  ;;  %v33_v6 = vld [vmem:[%s294_s1 + $0x60] sm:$0xff]  ;;  %v32_v8 = vld [vmem:[%s294_s1 + $0x58] sm:$0xff]  ;;  %v31_v10 = vld [vmem:[%s294_s1 + $0x50] sm:$0xff] }
   0x4   :  { %114 = vmatpush.msra.mxu2 %v35_v1  ;;  %58 = vmatpush.msra.mxu0 %v35_v1  ;;  %v49_v7 = vld [vmem:[%s294_s1 + $0xe0] sm:$0xff]  ;;  %v48_v9 = vld [vmem:[%s294_s1 + $0xd8] sm:$0xff]  ;;  %v47_v11 = vld [vmem:[%s294_s1 + $0xd0] sm:$0xff] }
   0x5   :  { %130 = vmatpush.msra.mxu3 %v51_v3  ;;  %81 = vmatpush.msra.mxu1 %v51_v3  ;;  %v30_v12 = vld [vmem:[%s294_s1 + $0x48] sm:$0xff]  ;;  %v29_v14 = vld [vmem:[%s294_s1 + $0x40] sm:$0xff]  ;;  %v28_v16 = vld [vmem:[%s294_s1 + $0x38] sm:$0xff] }
   0x6   :  { %115 = vmatpush.msra.mxu2 %v34_v4  ;;  %59 = vmatpush.msra.mxu0 %v34_v4  ;;  %v46_v13 = vld [vmem:[%s294_s1 + $0xc8] sm:$0xff]  ;;  %v45_v15 = vld [vmem:[%s294_s1 + $0xc0] sm:$0xff]  ;;  %v44_v17 = vld [vmem:[%s294_s1 + $0xb8] sm:$0xff] }
   0x7   :  { %131 = vmatpush.msra.mxu3 %v50_v5  ;;  %82 = vmatpush.msra.mxu1 %v50_v5  ;;  %v27_v18 = vld [vmem:[%s294_s1 + $0x30] sm:$0xff]  ;;  %v26_v20 = vld [vmem:[%s294_s1 + $0x28] sm:$0xff]  ;;  %v25_v22 = vld [vmem:[%s294_s1 + $0x20] sm:$0xff] }
   0x8   :  { %116 = vmatpush.msra.mxu2 %v33_v6  ;;  %60 = vmatpush.msra.mxu0 %v33_v6  ;;  %v43_v19 = vld [vmem:[%s294_s1 + $0xb0] sm:$0xff]  ;;  %v42_v21 = vld [vmem:[%s294_s1 + $0xa8] sm:$0xff]  ;;  %v41_v23 = vld [vmem:[%s294_s1 + $0xa0] sm:$0xff] }
   0x9   :  { %132 = vmatpush.msra.mxu3 %v49_v7  ;;  %83 = vmatpush.msra.mxu1 %v49_v7  ;;  %v24_v24 = vld [vmem:[%s294_s1 + $0x18] sm:$0xff]  ;;  %v23_v26 = vld [vmem:[%s294_s1 + $0x10] sm:$0xff]  ;;  %v22_v28 = vld [vmem:[%s294_s1 + $0x8] sm:$0xff] }
   0xa   :  { %117 = vmatpush.msra.mxu2 %v32_v8  ;;  %61 = vmatpush.msra.mxu0 %v32_v8  ;;  %v40_v25 = vld [vmem:[%s294_s1 + $0x98] sm:$0xff]  ;;  %v39_v27 = vld [vmem:[%s294_s1 + $0x90] sm:$0xff]  ;;  %v38_v29 = vld [vmem:[%s294_s1 + $0x88] sm:$0xff] }
   0xb   :  { %133 = vmatpush.msra.mxu3 %v48_v9  ;;  %84 = vmatpush.msra.mxu1 %v48_v9  ;;  %v21_v30 = vld [vmem:[%s294_s1] sm:$0xff]  ;;  %v19_v32 = vld [vmem:[%s296_s0 + $0x10] sm:$0xff]  ;;  %v20_v33 = vld [vmem:[%s296_s0 + $0x18] sm:$0xff] }
   0xc   :  { %118 = vmatpush.msra.mxu2 %v31_v10  ;;  %62 = vmatpush.msra.mxu0 %v31_v10  ;;  %v37_v31 = vld [vmem:[%s294_s1 + $0x80] sm:$0xff]  ;;  %v18_v35 = vld [vmem:[%s296_s0 + $0x8] sm:$0xff] }
   0xd   :  { %134 = vmatpush.msra.mxu3 %v47_v11  ;;  %85 = vmatpush.msra.mxu1 %v47_v11  ;;  %v17_v34 = vld [vmem:[%s296_s0] sm:$0xff]  ;;  %v104_v46 = vld [vmem:[%s297_s3 + $0x8] sm:$0xff] }
   0xe   :  { %119 = vmatpush.msra.mxu2 %v30_v12  ;;  %63 = vmatpush.msra.mxu0 %v30_v12  ;;  %v145_v36 = vld [vmem:[%s295_s2] ss:$0 sm:$0xff] }
   0xf   :  { %135 = vmatpush.msra.mxu3 %v46_v13  ;;  %86 = vmatpush.msra.mxu1 %v46_v13  ;;  %v103_v40 = vld [vmem:[%s297_s3] sm:$0xff] }
  0x10   :  { %120 = vmatpush.msra.mxu2 %v29_v14  ;;  %64 = vmatpush.msra.mxu0 %v29_v14 }
  0x11   :  { %136 = vmatpush.msra.mxu3 %v45_v15  ;;  %87 = vmatpush.msra.mxu1 %v45_v15 }
  0x12   :  { %121 = vmatpush.msra.mxu2 %v28_v16  ;;  %65 = vmatpush.msra.mxu0 %v28_v16 }
  0x13   :  { %137 = vmatpush.msra.mxu3 %v44_v17  ;;  %88 = vmatpush.msra.mxu1 %v44_v17 }
  0x14   :  { %122 = vmatpush.msra.mxu2 %v27_v18  ;;  %66 = vmatpush.msra.mxu0 %v27_v18 }
  0x15   :  { %138 = vmatpush.msra.mxu3 %v43_v19  ;;  %89 = vmatpush.msra.mxu1 %v43_v19 }
  0x16   :  { %123 = vmatpush.msra.mxu2 %v26_v20  ;;  %67 = vmatpush.msra.mxu0 %v26_v20 }
  0x17   :  { %139 = vmatpush.msra.mxu3 %v42_v21  ;;  %90 = vmatpush.msra.mxu1 %v42_v21 }
  0x18   :  { %124 = vmatpush.msra.mxu2 %v25_v22  ;;  %68 = vmatpush.msra.mxu0 %v25_v22 }
  0x19   :  { %140 = vmatpush.msra.mxu3 %v41_v23  ;;  %91 = vmatpush.msra.mxu1 %v41_v23 }
  0x1a   :  { %125 = vmatpush.msra.mxu2 %v24_v24  ;;  %69 = vmatpush.msra.mxu0 %v24_v24 }
  0x1b   :  { %141 = vmatpush.msra.mxu3 %v40_v25  ;;  %92 = vmatpush.msra.mxu1 %v40_v25 }
  0x1c   :  { %126 = vmatpush.msra.mxu2 %v23_v26  ;;  %70 = vmatpush.msra.mxu0 %v23_v26 }
  0x1d   :  { %142 = vmatpush.msra.mxu3 %v39_v27  ;;  %93 = vmatpush.msra.mxu1 %v39_v27 }
  0x1e   :  { %127 = vmatpush.msra.mxu2 %v22_v28  ;;  %71 = vmatpush.msra.mxu0 %v22_v28 }
  0x1f   :  { %143 = vmatpush.msra.mxu3 %v38_v29  ;;  %94 = vmatpush.msra.mxu1 %v38_v29 }
  0x20   :  { %128 = vmatpush.msra.mxu2 %v21_v30  ;;  %72 = vmatpush.msra.mxu0 %v21_v30 }
  0x21   :  { %144 = vmatpush.msra.mxu3 %v37_v31  ;;  %76 = vmatmul.f32.vlgmr.msra.gmra.mxu2 %v19_v32 }
  0x22   :  { %99 = vmatmul.f32.vlgmr.msra.gmra.mxu3 %v20_v33  ;;  %95 = vmatpush.msra.mxu1 %v37_v31 }
  0x23   :  { %73 = vmatmul.f32.vlgmr.msra.gmra.mxu0 %v17_v34  ;;  %96 = vmatmul.f32.vlgmr.msra.gmra.mxu1 %v18_v35 }
  0xa0   :  { %v74_v37 = vpop.f32.mrf.mxu0  ;;  %v97_v38 = vpop.f32.mrf.mxu1 }
  0xa1   :  { %v75_v39 = vadd.f32 %v145_v36, %v74_v37 }
  0xa3   :  { %v98_v41 = vadd.f32 %v97_v38, %v75_v39 }
  0xa4   :  { %v77_v42 = vpop.f32.mrf.mxu2 }
  0xa5   :  { %v100_v43 = vpop.f32.mrf.mxu3  ;;  %v78_v44 = vadd.f32 %v145_v36, %v77_v42  ;;  %v105_v45 = vadd.f32 %v103_v40, %v98_v41 }
  0xa7   :  { %107 = vst [vmem:[%s298_s4] sm:$0xff] %v105_v45  ;;  %v101_v47 = vadd.f32 %v100_v43, %v78_v44 }
  0xa9   :  { %v106_v48 = vadd.f32 %v104_v46, %v101_v47 }
  0xab   :  { %108 = vst [vmem:[%s298_s4 + $0x8] sm:$0xff] %v106_v48 }

// kernel: cross_attention_forward.17
= control target key start
LH: loop header
LB: loop body
LE: loop exit
PB: predicated region body
PF: predicated region fallthrough
CT: control target
= control target key end

     0   :  { %v254_v2 = vmov 128.0   ;;  %s427_s0 = inlined_call_operand.vmem [shape: f32[16,128], index: 0, kind: input, shape index: {}]   ;;  %s428_s1 = inlined_call_operand.vmem [shape: f32[1,128], index: 1, kind: input, shape index: {}]   ;;  %s429_s2 = inlined_call_operand.vmem [shape: f32[1,128], index: 2, kind: input, shape index: {}]   ;;  %s430_s3 = inlined_call_operand.vmem [shape: f32[128,256], index: 3, kind: input, shape index: {}]   ;;  %s431_s4 = inlined_call_operand.vmem [shape: f32[1,256], index: 4, kind: input, shape index: {}]   ;;  %s432_s5 = inlined_call_operand.vmem [shape: f32[16,256], index: 5, kind: output, shape index: {}]  }
   0x1   :  { %v21_v0 = vld [vmem:[%s427_s0 + $0x8] sm:$0xff]  ;;  %v20_v1 = vld [vmem:[%s427_s0] sm:$0xff]  ;;  %244 = vrcp.f32 %v254_v2  ;;  %v143_v17 = vld [vmem:[%s430_s3 + $0xf0] sm:$0xff] }
   0x2   :  { %24 = vadd.xlane.f32.xlu0 %v21_v0  ;;  %v144_v18 = vld [vmem:[%s430_s3 + $0xf8] sm:$0xff]  ;;  %209 = vmatpush.msra.mxu2 %v143_v17  ;;  %v141_v19 = vld [vmem:[%s430_s3 + $0xe0] sm:$0xff]  ;;  %v142_v20 = vld [vmem:[%s430_s3 + $0xe8] sm:$0xff] }
   0x3   :  { %225 = vmatpush.msra.mxu3 %v144_v18  ;;  %151 = vmatpush.msra.mxu0 %v143_v17  ;;  %v139_v21 = vld [vmem:[%s430_s3 + $0xd0] sm:$0xff]  ;;  %v140_v22 = vld [vmem:[%s430_s3 + $0xd8] sm:$0xff]  ;;  %v137_v23 = vld [vmem:[%s430_s3 + $0xc0] sm:$0xff] }
   0x4   :  { %174 = vmatpush.msra.mxu1 %v144_v18  ;;  %210 = vmatpush.msra.mxu2 %v141_v19  ;;  %v138_v24 = vld [vmem:[%s430_s3 + $0xc8] sm:$0xff]  ;;  %v135_v25 = vld [vmem:[%s430_s3 + $0xb0] sm:$0xff]  ;;  %v136_v26 = vld [vmem:[%s430_s3 + $0xb8] sm:$0xff] }
   0x5   :  { %226 = vmatpush.msra.mxu3 %v142_v20  ;;  %152 = vmatpush.msra.mxu0 %v141_v19  ;;  %v133_v27 = vld [vmem:[%s430_s3 + $0xa0] sm:$0xff]  ;;  %v134_v28 = vld [vmem:[%s430_s3 + $0xa8] sm:$0xff]  ;;  %v131_v29 = vld [vmem:[%s430_s3 + $0x90] sm:$0xff] }
   0x6   :  { %175 = vmatpush.msra.mxu1 %v142_v20  ;;  %211 = vmatpush.msra.mxu2 %v139_v21  ;;  %v132_v30 = vld [vmem:[%s430_s3 + $0x98] sm:$0xff]  ;;  %v129_v31 = vld [vmem:[%s430_s3 + $0x80] sm:$0xff]  ;;  %v130_v32 = vld [vmem:[%s430_s3 + $0x88] sm:$0xff] }
   0x7   :  { %v245_v3 = vpop.eup %244  ;;  %227 = vmatpush.msra.mxu3 %v140_v22  ;;  %153 = vmatpush.msra.mxu0 %v139_v21  ;;  %v127_v33 = vld [vmem:[%s430_s3 + $0x70] sm:$0xff]  ;;  %v128_v34 = vld [vmem:[%s430_s3 + $0x78] sm:$0xff]  ;;  %v125_v35 = vld [vmem:[%s430_s3 + $0x60] sm:$0xff] }
   0x8   :  { %v27_v4 = vmul.f32 128.0, %v245_v3  ;;  %vm31_vm0 = vweird.f32 %v245_v3  ;;  %176 = vmatpush.msra.mxu1 %v140_v22  ;;  %212 = vmatpush.msra.mxu2 %v137_v23  ;;  %v126_v36 = vld [vmem:[%s430_s3 + $0x68] sm:$0xff]  ;;  %v123_v39 = vld [vmem:[%s430_s3 + $0x50] sm:$0xff]  ;;  %v124_v40 = vld [vmem:[%s430_s3 + $0x58] sm:$0xff] }
   0x9   :  { %228 = vmatpush.msra.mxu3 %v138_v24  ;;  %154 = vmatpush.msra.mxu0 %v137_v23  ;;  %v121_v41 = vld [vmem:[%s430_s3 + $0x40] sm:$0xff]  ;;  %v122_v42 = vld [vmem:[%s430_s3 + $0x48] sm:$0xff]  ;;  %v119_v43 = vld [vmem:[%s430_s3 + $0x30] sm:$0xff] }
   0xa   :  { %22 = vadd.xlane.f32.xlu0 %v20_v1  ;;  %v28_v5 = vsub.f32 1.0, %v27_v4  ;;  %177 = vmatpush.msra.mxu1 %v138_v24  ;;  %v120_v44 = vld [vmem:[%s430_s3 + $0x38] sm:$0xff]  ;;  %v117_v45 = vld [vmem:[%s430_s3 + $0x20] sm:$0xff]  ;;  %v118_v46 = vld [vmem:[%s430_s3 + $0x28] sm:$0xff] }
   0xb   :  { %213 = vmatpush.msra.mxu2 %v135_v25  ;;  %229 = vmatpush.msra.mxu3 %v136_v26  ;;  %v115_v50 = vld [vmem:[%s430_s3 + $0x10] sm:$0xff]  ;;  %v116_v51 = vld [vmem:[%s430_s3 + $0x18] sm:$0xff]  ;;  %v113_v53 = vld [vmem:[%s430_s3] sm:$0xff] }
   0xc   :  { %v29_v6 = vmul.f32 %v245_v3, %v28_v5  ;;  %155 = vmatpush.msra.mxu0 %v135_v25  ;;  %178 = vmatpush.msra.mxu1 %v136_v26  ;;  %v114_v54 = vld [vmem:[%s430_s3 + $0x8] sm:$0xff]  ;;  %v242_v17 = vld [vmem:[%s428_s1] ss:$0 sm:$0xff] }
   0xd   :  { %214 = vmatpush.msra.mxu2 %v133_v27  ;;  %230 = vmatpush.msra.mxu3 %v134_v28  ;;  %v243_v25 = vld [vmem:[%s429_s2] ss:$0 sm:$0xff] }
   0xe   :  { %v30_v7 = vadd.f32 %v245_v3, %v29_v6  ;;  %156 = vmatpush.msra.mxu0 %v133_v27  ;;  %179 = vmatpush.msra.mxu1 %v134_v28 }
   0xf   :  { %215 = vmatpush.msra.mxu2 %v131_v29  ;;  %231 = vmatpush.msra.mxu3 %v132_v30 }
  0x10   :  { %v32_v8 = vsel %vm31_vm0, %v245_v3, %v30_v7  ;;  %157 = vmatpush.msra.mxu0 %v131_v29  ;;  %180 = vmatpush.msra.mxu1 %v132_v30 }
  0x11   :  { %216 = vmatpush.msra.mxu2 %v129_v31  ;;  %232 = vmatpush.msra.mxu3 %v130_v32 }
  0x12   :  { %158 = vmatpush.msra.mxu0 %v129_v31  ;;  %181 = vmatpush.msra.mxu1 %v130_v32 }
  0x13   :  { %217 = vmatpush.msra.mxu2 %v127_v33  ;;  %233 = vmatpush.msra.mxu3 %v128_v34 }
  0x14   :  { %159 = vmatpush.msra.mxu0 %v127_v33  ;;  %182 = vmatpush.msra.mxu1 %v128_v34 }
  0x15   :  { %218 = vmatpush.msra.mxu2 %v125_v35  ;;  %234 = vmatpush.msra.mxu3 %v126_v36 }
  0x16   :  { %160 = vmatpush.msra.mxu0 %v125_v35  ;;  %183 = vmatpush.msra.mxu1 %v126_v36 }
  0x17   :  { %219 = vmatpush.msra.mxu2 %v123_v39  ;;  %235 = vmatpush.msra.mxu3 %v124_v40 }
  0x18   :  { %161 = vmatpush.msra.mxu0 %v123_v39  ;;  %184 = vmatpush.msra.mxu1 %v124_v40  ;;  %v145_v40 = vld [vmem:[%s431_s4] sm:$0x3] }
  0x19   :  { %220 = vmatpush.msra.mxu2 %v121_v41  ;;  %236 = vmatpush.msra.mxu3 %v122_v42 }
  0x1a   :  { %162 = vmatpush.msra.mxu0 %v121_v41  ;;  %185 = vmatpush.msra.mxu1 %v122_v42  ;;  %v147_v41 = vperm.slane %v145_v40, 0  ;;  %v148_v42 = vperm.slane %v145_v40, 1 }
  0x1b   :  { %221 = vmatpush.msra.mxu2 %v119_v43  ;;  %237 = vmatpush.msra.mxu3 %v120_v44 }
  0x1c   :  { %163 = vmatpush.msra.mxu0 %v119_v43  ;;  %186 = vmatpush.msra.mxu1 %v120_v44 }
  0x1d   :  { %222 = vmatpush.msra.mxu2 %v117_v45  ;;  %238 = vmatpush.msra.mxu3 %v118_v46 }
  0x1e   :  { %164 = vmatpush.msra.mxu0 %v117_v45  ;;  %187 = vmatpush.msra.mxu1 %v118_v46 }
  0x1f   :  { %223 = vmatpush.msra.mxu2 %v115_v50  ;;  %239 = vmatpush.msra.mxu3 %v116_v51 }
  0x20   :  { %165 = vmatpush.msra.mxu0 %v115_v50  ;;  %188 = vmatpush.msra.mxu1 %v116_v51 }
  0x21   :  { %224 = vmatpush.msra.mxu2 %v113_v53  ;;  %240 = vmatpush.msra.mxu3 %v114_v54 }
  0x22   :  { %166 = vmatpush.msra.mxu0 %v113_v53  ;;  %189 = vmatpush.msra.mxu1 %v114_v54 }
  0x75   :  { %v25_v9 = vpop.xlane.xlu0 %24 }
  0x76   :  { %v34_v10 = vmul.f32 %v32_v8, %v25_v9 }
  0x78   :  { %v291_v11 = vsub.f32 %v21_v0, %v34_v10 }
  0x7a   :  { %v38_v12 = vmul.f32 %v291_v11, %v291_v11  ;;  %v50_v23 = vmul.f32 %v242_v17, %v291_v11 }
  0x7c   :  { %41 = vadd.xlane.f32.xlu1 %v38_v12 }
  0x7d   :  { %v23_v13 = vpop.xlane.xlu0 %22 }
  0x7e   :  { %v33_v14 = vmul.f32 %v32_v8, %v23_v13 }
  0x80   :  { %v295_v15 = vsub.f32 %v20_v1, %v33_v14 }
  0x82   :  { %v37_v16 = vmul.f32 %v295_v15, %v295_v15  ;;  %v49_v35 = vmul.f32 %v242_v17, %v295_v15 }
  0x84   :  { %39 = vadd.xlane.f32.xlu1 %v37_v16 }
  0xef   :  { %v42_v37 = vpop.xlane.xlu1 %41 }
  0xf0   :  { %v359_v38 = vmul.f32 0.007874016, %v42_v37 }
  0xf2   :  { %246 = vrsqrt.f32 %v359_v38  ;;  %vm70_vm1 = vcmp.eq.f32.partialorder %v359_v38, inf  ;;  %v73_v63 = vand.u32 2147483648, %v359_v38  ;;  %vm72_vm2 = vcmp.eq.f32.partialorder %v359_v38, 0.0 }
  0xf7   :  { %v40_v47 = vpop.xlane.xlu1 %39 }
  0xf8   :  { %v247_v48 = vpop.eup %246  ;;  %v43_v49 = vmul.f32 0.007874016, %v40_v47 }
  0xf9   :  { %v64_v52 = vmul.f32 %v247_v48, %v359_v38 }
  0xfa   :  { %248 = vrsqrt.f32 %v43_v49  ;;  %vm58_vm3 = vcmp.eq.f32.partialorder %v43_v49, inf  ;;  %v61_v7 = vand.u32 2147483648, %v43_v49  ;;  %vm60_vm4 = vcmp.eq.f32.partialorder %v43_v49, 0.0 }
  0xfb   :  { %v65_v55 = vmul.f32 %v247_v48, %v64_v52 }
  0xfd   :  { %v66_v56 = vmul.f32 0.5, %v65_v55 }
  0xff   :  { %v67_v57 = vsub.f32 1.5, %v66_v56 }
 0x100   :  { %v249_v58 = vpop.eup %248 }
 0x101   :  { %v68_v59 = vmul.f32 %v247_v48, %v67_v57  ;;  %v52_v60 = vmul.f32 %v249_v58, %v43_v49 }
 0x103   :  { %v69_v61 = vmul.f32 %v68_v59, %v359_v38  ;;  %v53_v62 = vmul.f32 %v249_v58, %v52_v60 }
 0x105   :  { %v54_v0 = vmul.f32 0.5, %v53_v62  ;;  %v71_v1 = vsel %vm70_vm1, %v359_v38, %v69_v61 }
 0x106   :  { %v74_v2 = vsel %vm72_vm2, %v73_v63, %v71_v1 }
 0x107   :  { %v55_v3 = vsub.f32 1.5, %v54_v0  ;;  %v76_v4 = vadd.f32 1e-06, %v74_v2 }
 0x109   :  { %v56_v5 = vmul.f32 %v249_v58, %v55_v3  ;;  %250 = vrcp.f32 %v76_v4  ;;  %v103_v16 = vand.u32 2147483648, %v76_v4  ;;  %v101_v19 = vand.u32 2147483647, %v76_v4 }
 0x10a   :  { %vm97_vm6 = vweird.f32 %v76_v4 }
 0x10b   :  { %v57_v6 = vmul.f32 %v56_v5, %v43_v49  ;;  %v104_v22 = vor.u32 1.1754944e-38, %v103_v16  ;;  %vm102_vm8 = vcmp.eq.f32.partialorder %v101_v19, 8.507059e+37 }
 0x10d   :  { %v59_v8 = vsel %vm58_vm3, %v43_v49, %v57_v6 }
 0x10e   :  { %v62_v9 = vsel %vm60_vm4, %v61_v7, %v59_v8 }
 0x10f   :  { %v251_v10 = vpop.eup %250  ;;  %v75_v12 = vadd.f32 1e-06, %v62_v9 }
 0x110   :  { %v93_v13 = vmul.f32 %v251_v10, %v76_v4  ;;  %vm98_vm5 = vweird.f32 %v251_v10 }
 0x111   :  { %252 = vrcp.f32 %v75_v12  ;;  %vm99_vm7 = vmor %vm97_vm6, %vm98_vm5  ;;  %v88_v30 = vand.u32 2147483648, %v75_v12  ;;  %v86_v33 = vand.u32 2147483647, %v75_v12  ;;  %vm82_vm10 = vweird.f32 %v75_v12 }
 0x112   :  { %v94_v14 = vsub.f32 1.0, %v93_v13 }
 0x113   :  { %v89_v11 = vor.u32 1.1754944e-38, %v88_v30  ;;  %vm87_vm12 = vcmp.eq.f32.partialorder %v86_v33, 8.507059e+37 }
 0x114   :  { %v95_v18 = vmul.f32 %v251_v10, %v94_v14 }
 0x116   :  { %v96_v20 = vadd.f32 %v251_v10, %v95_v18 }
 0x117   :  { %v253_v21 = vpop.eup %252 }
 0x118   :  { %v100_v24 = vsel %vm99_vm7, %v251_v10, %v96_v20  ;;  %v78_v26 = vmul.f32 %v253_v21, %v75_v12  ;;  %vm83_vm9 = vweird.f32 %v253_v21 }
 0x119   :  { %v105_v27 = vsel %vm102_vm8, %v104_v22, %v100_v24  ;;  %vm84_vm11 = vmor %vm82_vm10, %vm83_vm9 }
 0x11a   :  { %v106_v28 = vmul.f32 %v105_v27, %v50_v23  ;;  %v79_v29 = vsub.f32 1.0, %v78_v26 }
 0x11c   :  { %v112_v31 = vadd.f32 %v243_v25, %v106_v28  ;;  %v80_v32 = vmul.f32 %v253_v21, %v79_v29 }
 0x11e   :  { %170 = vmatmul.f32.vlgmr.msra.gmra.mxu2 %v112_v31  ;;  %193 = vmatmul.f32.vlgmr.msra.gmra.mxu3 %v112_v31  ;;  %v81_v34 = vadd.f32 %v253_v21, %v80_v32 }
 0x120   :  { %v85_v36 = vsel %vm84_vm11, %v253_v21, %v81_v34 }
 0x121   :  { %v90_v37 = vsel %vm87_vm12, %v89_v11, %v85_v36 }
 0x122   :  { %v91_v38 = vmul.f32 %v90_v37, %v49_v35 }
 0x124   :  { %v111_v39 = vadd.f32 %v243_v25, %v91_v38 }
 0x126   :  { %167 = vmatmul.f32.vlgmr.msra.gmra.mxu0 %v111_v39  ;;  %190 = vmatmul.f32.vlgmr.msra.gmra.mxu1 %v111_v39 }
 0x1a1   :  { %v171_v43 = vpop.f32.mrf.mxu2  ;;  %v194_v44 = vpop.f32.mrf.mxu3 }
 0x1a2   :  { %v172_v45 = vadd.f32 %v171_v43, %v147_v41  ;;  %v195_v46 = vadd.f32 %v194_v44, %v148_v42 }
 0x1a3   :  { %v168_v47 = vpop.f32.mrf.mxu0  ;;  %v191_v48 = vpop.f32.mrf.mxu1 }
 0x1a4   :  { %v199_v15 = vmax.f32 %v172_v45, 0.0  ;;  %v200_v49 = vmax.f32 %v195_v46, 0.0  ;;  %v169_v50 = vadd.f32 %v168_v47, %v147_v41  ;;  %v192_v51 = vadd.f32 %v191_v48, %v148_v42 }
 0x1a6   :  { %203 = vst [vmem:[%s432_s5 + $0x10] sm:$0xff] %v199_v15  ;;  %v197_v52 = vmax.f32 %v169_v50, 0.0  ;;  %v198_v53 = vmax.f32 %v192_v51, 0.0 }
 0x1a7   :  { %204 = vst [vmem:[%s432_s5 + $0x18] sm:$0xff] %v200_v49 }
 0x1a8   :  { %201 = vst [vmem:[%s432_s5] sm:$0xff] %v197_v52 }
 0x1a9   :  { %202 = vst [vmem:[%s432_s5 + $0x8] sm:$0xff] %v198_v53 }

// kernel: cross_attention_forward.19
= control target key start
LH: loop header
LB: loop body
LE: loop exit
PB: predicated region body
PF: predicated region fallthrough
CT: control target
= control target key end

     0   :  { %s486_s0 = inlined_call_operand.vmem [shape: f32[16,128], index: 0, kind: input, shape index: {}]   ;;  %s487_s1 = inlined_call_operand.vmem [shape: f32[1,128], index: 1, kind: input, shape index: {}]   ;;  %s488_s2 = inlined_call_operand.vmem [shape: f32[1,128], index: 2, kind: input, shape index: {}]   ;;  %s489_s3 = inlined_call_operand.vmem [shape: f32[16,128], index: 3, kind: input, shape index: {}]   ;;  %s490_s4 = inlined_call_operand.vmem [shape: f32[128,128], index: 4, kind: input, shape index: {}]   ;;  %s491_s5 = inlined_call_operand.vmem [shape: f32[128,128], index: 5, kind: input, shape index: {}]   ;;  %s492_s6 = inlined_call_operand.vmem [shape: f32[1,128], index: 6, kind: input, shape index: {}]   ;;  %s493_s7 = inlined_call_operand.hbm [shape: f32[16,128], index: 7, kind: output, shape index: {}]  }
   0x1   :  { %v28_v0 = vld [vmem:[%s486_s0 + $0x8] sm:$0xff] }
   0x2   :  { %31 = vadd.xlane.f32.xlu0 %v28_v0 }
   0x3   :  { %12 = vsyncpa [#allocation3], 0  ;;  %v27_v1 = vld [vmem:[%s486_s0] sm:$0xff]  ;;  %v303_v2 = vmov 128.0   ;;  %v153_v17 = vld [vmem:[%s491_s5 + $0x78] sm:$0xff]  ;;  %s304_s25 = smov [#allocation2]  }
   0x4   :  { %267 = vrcp.f32 %v303_v2  ;;  %v135_v18 = vld [vmem:[%s490_s4 + $0x78] sm:$0xff]  ;;  %228 = vmatpush.msra.mxu2 %v153_v17  ;;  %v152_v19 = vld [vmem:[%s491_s5 + $0x70] sm:$0xff]  ;;  %154 = vmatpush.msra.mxu0 %v153_v17  ;;  %v151_v21 = vld [vmem:[%s491_s5 + $0x68] sm:$0xff]  ;;  %s214_s26 = sshll.u32 %s304_s25, 4  ;;  %s216_s28 = sshll.u32 %s493_s7, 4  ;;  %s215_s26 = int_to_ptr.vmem [resolvable:$true] %s214_s26  ;;  %s217_s28 = int_to_ptr.hbm [resolvable:$true] %s216_s28 }
   0x5   :  { %244 = vmatpush.msra.mxu3 %v135_v18  ;;  %v134_v20 = vld [vmem:[%s490_s4 + $0x70] sm:$0xff]  ;;  %177 = vmatpush.msra.mxu1 %v135_v18  ;;  %v133_v22 = vld [vmem:[%s490_s4 + $0x68] sm:$0xff]  ;;  %v150_v23 = vld [vmem:[%s491_s5 + $0x60] sm:$0xff]  ;;  %s306_s29 = smov 8  }
   0x6   :  { %229 = vmatpush.msra.mxu2 %v152_v19  ;;  %155 = vmatpush.msra.mxu0 %v152_v19  ;;  %v132_v24 = vld [vmem:[%s490_s4 + $0x60] sm:$0xff]  ;;  %v149_v25 = vld [vmem:[%s491_s5 + $0x58] sm:$0xff]  ;;  %v148_v27 = vld [vmem:[%s491_s5 + $0x50] sm:$0xff] }
   0x7   :  { %245 = vmatpush.msra.mxu3 %v134_v20  ;;  %178 = vmatpush.msra.mxu1 %v134_v20  ;;  %v131_v26 = vld [vmem:[%s490_s4 + $0x58] sm:$0xff]  ;;  %v130_v28 = vld [vmem:[%s490_s4 + $0x50] sm:$0xff]  ;;  %v147_v29 = vld [vmem:[%s491_s5 + $0x48] sm:$0xff] }
   0x8   :  { %230 = vmatpush.msra.mxu2 %v151_v21  ;;  %156 = vmatpush.msra.mxu0 %v151_v21  ;;  %v129_v30 = vld [vmem:[%s490_s4 + $0x48] sm:$0xff]  ;;  %v146_v31 = vld [vmem:[%s491_s5 + $0x40] sm:$0xff]  ;;  %v145_v33 = vld [vmem:[%s491_s5 + $0x38] sm:$0xff] }
   0x9   :  { %246 = vmatpush.msra.mxu3 %v133_v22  ;;  %179 = vmatpush.msra.mxu1 %v133_v22  ;;  %v128_v32 = vld [vmem:[%s490_s4 + $0x40] sm:$0xff]  ;;  %v127_v34 = vld [vmem:[%s490_s4 + $0x38] sm:$0xff]  ;;  %v144_v35 = vld [vmem:[%s491_s5 + $0x30] sm:$0xff] }
   0xa   :  { %29 = vadd.xlane.f32.xlu0 %v27_v1  ;;  %v268_v3 = vpop.eup %267  ;;  %231 = vmatpush.msra.mxu2 %v150_v23  ;;  %v126_v36 = vld [vmem:[%s490_s4 + $0x30] sm:$0xff]  ;;  %v143_v39 = vld [vmem:[%s491_s5 + $0x28] sm:$0xff]  ;;  %v142_v41 = vld [vmem:[%s491_s5 + $0x20] sm:$0xff] }
   0xb   :  { %v34_v4 = vmul.f32 128.0, %v268_v3  ;;  %vm38_vm0 = vweird.f32 %v268_v3  ;;  %247 = vmatpush.msra.mxu3 %v132_v24  ;;  %157 = vmatpush.msra.mxu0 %v150_v23  ;;  %v125_v40 = vld [vmem:[%s490_s4 + $0x28] sm:$0xff]  ;;  %v124_v42 = vld [vmem:[%s490_s4 + $0x20] sm:$0xff]  ;;  %v141_v43 = vld [vmem:[%s491_s5 + $0x18] sm:$0xff] }
   0xc   :  { %180 = vmatpush.msra.mxu1 %v132_v24  ;;  %232 = vmatpush.msra.mxu2 %v149_v25  ;;  %v123_v44 = vld [vmem:[%s490_s4 + $0x18] sm:$0xff]  ;;  %v140_v45 = vld [vmem:[%s491_s5 + $0x10] sm:$0xff]  ;;  %v139_v50 = vld [vmem:[%s491_s5 + $0x8] sm:$0xff] }
   0xd   :  { %v35_v5 = vsub.f32 1.0, %v34_v4  ;;  %248 = vmatpush.msra.mxu3 %v131_v26  ;;  %158 = vmatpush.msra.mxu0 %v149_v25  ;;  %v122_v46 = vld [vmem:[%s490_s4 + $0x10] sm:$0xff]  ;;  %v121_v51 = vld [vmem:[%s490_s4 + $0x8] sm:$0xff]  ;;  %v138_v53 = vld [vmem:[%s491_s5] sm:$0xff] }
   0xe   :  { %181 = vmatpush.msra.mxu1 %v131_v26  ;;  %233 = vmatpush.msra.mxu2 %v148_v27  ;;  %v120_v54 = vld [vmem:[%s490_s4] sm:$0xff]  ;;  %v137_v56 = vld [vmem:[%s489_s3 + $0x8] sm:$0xff] }
   0xf   :  { %v36_v6 = vmul.f32 %v268_v3, %v35_v5  ;;  %249 = vmatpush.msra.mxu3 %v130_v28  ;;  %159 = vmatpush.msra.mxu0 %v148_v27  ;;  %v136_v58 = vld [vmem:[%s489_s3] sm:$0xff] }
  0x10   :  { %182 = vmatpush.msra.mxu1 %v130_v28  ;;  %234 = vmatpush.msra.mxu2 %v147_v29  ;;  %v264_v19 = vld [vmem:[%s487_s1] ss:$0 sm:$0xff] }
  0x11   :  { %v37_v7 = vadd.f32 %v268_v3, %v36_v6  ;;  %250 = vmatpush.msra.mxu3 %v129_v30  ;;  %160 = vmatpush.msra.mxu0 %v147_v29  ;;  %v265_v27 = vld [vmem:[%s488_s2] ss:$0 sm:$0xff] }
  0x12   :  { %183 = vmatpush.msra.mxu1 %v129_v30  ;;  %235 = vmatpush.msra.mxu2 %v146_v31 }
  0x13   :  { %v39_v8 = vsel %vm38_vm0, %v268_v3, %v37_v7  ;;  %251 = vmatpush.msra.mxu3 %v128_v32  ;;  %161 = vmatpush.msra.mxu0 %v146_v31 }
  0x14   :  { %184 = vmatpush.msra.mxu1 %v128_v32  ;;  %236 = vmatpush.msra.mxu2 %v145_v33 }
  0x15   :  { %252 = vmatpush.msra.mxu3 %v127_v34  ;;  %162 = vmatpush.msra.mxu0 %v145_v33 }
  0x16   :  { %185 = vmatpush.msra.mxu1 %v127_v34  ;;  %237 = vmatpush.msra.mxu2 %v144_v35 }
  0x17   :  { %253 = vmatpush.msra.mxu3 %v126_v36  ;;  %163 = vmatpush.msra.mxu0 %v144_v35 }
  0x18   :  { %186 = vmatpush.msra.mxu1 %v126_v36  ;;  %238 = vmatpush.msra.mxu2 %v143_v39 }
  0x19   :  { %254 = vmatpush.msra.mxu3 %v125_v40  ;;  %164 = vmatpush.msra.mxu0 %v143_v39 }
  0x1a   :  { %187 = vmatpush.msra.mxu1 %v125_v40  ;;  %239 = vmatpush.msra.mxu2 %v142_v41 }
  0x1b   :  { %255 = vmatpush.msra.mxu3 %v124_v42  ;;  %165 = vmatpush.msra.mxu0 %v142_v41 }
  0x1c   :  { %188 = vmatpush.msra.mxu1 %v124_v42  ;;  %240 = vmatpush.msra.mxu2 %v141_v43 }
  0x1d   :  { %256 = vmatpush.msra.mxu3 %v123_v44  ;;  %166 = vmatpush.msra.mxu0 %v141_v43  ;;  %v266_v43 = vld [vmem:[%s492_s6] ss:$0 sm:$0xff]  ;;  %s305_s6 = smov 128  }
  0x1e   :  { %189 = vmatpush.msra.mxu1 %v123_v44  ;;  %241 = vmatpush.msra.mxu2 %v140_v45 }
  0x1f   :  { %257 = vmatpush.msra.mxu3 %v122_v46  ;;  %167 = vmatpush.msra.mxu0 %v140_v45 }
  0x20   :  { %190 = vmatpush.msra.mxu1 %v122_v46  ;;  %242 = vmatpush.msra.mxu2 %v139_v50 }
  0x21   :  { %258 = vmatpush.msra.mxu3 %v121_v51  ;;  %168 = vmatpush.msra.mxu0 %v139_v50 }
  0x22   :  { %191 = vmatpush.msra.mxu1 %v121_v51  ;;  %243 = vmatpush.msra.mxu2 %v138_v53 }
  0x23   :  { %259 = vmatpush.msra.mxu3 %v120_v54  ;;  %173 = vmatmul.f32.vlgmr.msra.gmra.mxu2 %v137_v56 }
  0x24   :  { %169 = vmatpush.msra.mxu0 %v138_v53  ;;  %192 = vmatpush.msra.mxu1 %v120_v54 }
  0x25   :  { %170 = vmatmul.f32.vlgmr.msra.gmra.mxu0 %v136_v58 }
  0x75   :  { %v32_v9 = vpop.xlane.xlu0 %31 }
  0x76   :  { %v41_v10 = vmul.f32 %v39_v8, %v32_v9 }
  0x78   :  { %v353_v11 = vsub.f32 %v28_v0, %v41_v10 }
  0x7a   :  { %v45_v12 = vmul.f32 %v353_v11, %v353_v11  ;;  %v57_v25 = vmul.f32 %v264_v19, %v353_v11 }
  0x7c   :  { %48 = vadd.xlane.f32.xlu1 %v45_v12 }
  0x7d   :  { %v30_v13 = vpop.xlane.xlu0 %29 }
  0x7e   :  { %v40_v14 = vmul.f32 %v39_v8, %v30_v13 }
  0x80   :  { %v357_v15 = vsub.f32 %v27_v1, %v40_v14 }
  0x82   :  { %v44_v16 = vmul.f32 %v357_v15, %v357_v15 }
  0x84   :  { %46 = vadd.xlane.f32.xlu1 %v44_v16 }
  0xa2   :  { %v171_v45 = vpop.f32.mrf.mxu0 }
  0xa6   :  { %v174_v42 = vpop.f32.mrf.mxu2 }
  0xef   :  { %v49_v37 = vpop.xlane.xlu1 %48 }
  0xf0   :  { %v421_v38 = vmul.f32 0.007874016, %v49_v37  ;;  %v56_v37 = vmul.f32 %v264_v19, %v357_v15 }
  0xf2   :  { %269 = vrsqrt.f32 %v421_v38  ;;  %vm77_vm1 = vcmp.eq.f32.partialorder %v421_v38, inf  ;;  %v80_v1 = vand.u32 2147483648, %v421_v38  ;;  %vm79_vm2 = vcmp.eq.f32.partialorder %v421_v38, 0.0 }
  0xf7   :  { %v47_v47 = vpop.xlane.xlu1 %46 }
  0xf8   :  { %v270_v48 = vpop.eup %269  ;;  %v50_v49 = vmul.f32 0.007874016, %v47_v47 }
  0xf9   :  { %v71_v52 = vmul.f32 %v270_v48, %v421_v38 }
  0xfa   :  { %271 = vrsqrt.f32 %v50_v49  ;;  %vm65_vm3 = vcmp.eq.f32.partialorder %v50_v49, inf  ;;  %v68_v9 = vand.u32 2147483648, %v50_v49  ;;  %vm67_vm4 = vcmp.eq.f32.partialorder %v50_v49, 0.0 }
  0xfb   :  { %v72_v55 = vmul.f32 %v270_v48, %v71_v52 }
  0xfd   :  { %v73_v57 = vmul.f32 0.5, %v72_v55 }
  0xff   :  { %v74_v59 = vsub.f32 1.5, %v73_v57 }
 0x100   :  { %v272_v60 = vpop.eup %271 }
 0x101   :  { %v75_v61 = vmul.f32 %v270_v48, %v74_v59  ;;  %v59_v62 = vmul.f32 %v272_v60, %v50_v49 }
 0x103   :  { %v76_v63 = vmul.f32 %v75_v61, %v421_v38  ;;  %v60_v0 = vmul.f32 %v272_v60, %v59_v62 }
 0x105   :  { %v61_v2 = vmul.f32 0.5, %v60_v0  ;;  %v78_v3 = vsel %vm77_vm1, %v421_v38, %v76_v63 }
 0x106   :  { %v81_v4 = vsel %vm79_vm2, %v80_v1, %v78_v3 }
 0x107   :  { %v62_v5 = vsub.f32 1.5, %v61_v2  ;;  %v83_v6 = vadd.f32 1e-06, %v81_v4 }
 0x109   :  { %v63_v7 = vmul.f32 %v272_v60, %v62_v5  ;;  %273 = vrcp.f32 %v83_v6  ;;  %v110_v18 = vand.u32 2147483648, %v83_v6  ;;  %v108_v21 = vand.u32 2147483647, %v83_v6 }
 0x10a   :  { %vm104_vm6 = vweird.f32 %v83_v6 }
 0x10b   :  { %v64_v8 = vmul.f32 %v63_v7, %v50_v49  ;;  %v111_v24 = vor.u32 1.1754944e-38, %v110_v18  ;;  %vm109_vm8 = vcmp.eq.f32.partialorder %v108_v21, 8.507059e+37 }
 0x10d   :  { %v66_v10 = vsel %vm65_vm3, %v50_v49, %v64_v8 }
 0x10e   :  { %v69_v12 = vsel %vm67_vm4, %v68_v9, %v66_v10 }
 0x10f   :  { %v274_v13 = vpop.eup %273  ;;  %v82_v14 = vadd.f32 1e-06, %v69_v12 }
 0x110   :  { %v100_v16 = vmul.f32 %v274_v13, %v83_v6  ;;  %vm105_vm5 = vweird.f32 %v274_v13 }
 0x111   :  { %275 = vrcp.f32 %v82_v14  ;;  %vm106_vm7 = vmor %vm104_vm6, %vm105_vm5  ;;  %v95_v32 = vand.u32 2147483648, %v82_v14  ;;  %v93_v35 = vand.u32 2147483647, %v82_v14  ;;  %vm89_vm10 = vweird.f32 %v82_v14 }
 0x112   :  { %v101_v17 = vsub.f32 1.0, %v100_v16 }
 0x113   :  { %v96_v11 = vor.u32 1.1754944e-38, %v95_v32  ;;  %vm94_vm12 = vcmp.eq.f32.partialorder %v93_v35, 8.507059e+37 }
 0x114   :  { %v102_v20 = vmul.f32 %v274_v13, %v101_v17 }
 0x116   :  { %v103_v22 = vadd.f32 %v274_v13, %v102_v20 }
 0x117   :  { %v276_v23 = vpop.eup %275 }
 0x118   :  { %v107_v26 = vsel %vm106_vm7, %v274_v13, %v103_v22  ;;  %v85_v28 = vmul.f32 %v276_v23, %v82_v14  ;;  %vm90_vm9 = vweird.f32 %v276_v23 }
 0x119   :  { %v112_v29 = vsel %vm109_vm8, %v111_v24, %v107_v26  ;;  %vm91_vm11 = vmor %vm89_vm10, %vm90_vm9 }
 0x11a   :  { %v113_v30 = vmul.f32 %v112_v29, %v57_v25  ;;  %v86_v31 = vsub.f32 1.0, %v85_v28 }
 0x11c   :  { %v119_v33 = vadd.f32 %v265_v27, %v113_v30  ;;  %v87_v34 = vmul.f32 %v276_v23, %v86_v31 }
 0x11e   :  { %196 = vmatmul.f32.vlgmr.msra.gmra.mxu3 %v119_v33  ;;  %v88_v36 = vadd.f32 %v276_v23, %v87_v34 }
 0x120   :  { %v92_v38 = vsel %vm91_vm11, %v276_v23, %v88_v36 }
 0x121   :  { %v97_v39 = vsel %vm94_vm12, %v96_v11, %v92_v38 }
 0x122   :  { %v98_v40 = vmul.f32 %v97_v39, %v56_v37 }
 0x124   :  { %v118_v41 = vadd.f32 %v265_v27, %v98_v40 }
 0x126   :  { %193 = vmatmul.f32.vlgmr.msra.gmra.mxu1 %v118_v41 }
 0x1a1   :  { %v197_v44 = vpop.f32.mrf.mxu3 }
 0x1a2   :  { %v198_v46 = vadd.f32 %v197_v44, %v174_v42 }
 0x1a3   :  { %v194_v47 = vpop.f32.mrf.mxu1 }
 0x1a4   :  { %v205_v48 = vadd.f32 %v266_v43, %v198_v46  ;;  %v195_v49 = vadd.f32 %v194_v47, %v171_v45 }
 0x1a6   :  { %v207_v15 = vmax.f32 %v205_v48, 0.0  ;;  %v204_v50 = vadd.f32 %v266_v43, %v195_v49 }
 0x1a8   :  { %209 = vst [vmem:[#allocation2 + $0x8] sm:$0xff] %v207_v15  ;;  %v206_v51 = vmax.f32 %v204_v50, 0.0 }
 0x1aa   :  { %208 = vst [vmem:[#allocation2] sm:$0xff] %v206_v51 }
 0x1ab   :  { %222 = dma.vmem_to_hbm [thread:$0]  %s215_s26, 256, %s217_s28, [#allocation3], %s305_s6, %s305_s6, %s306_s29  }
 0x1ac   :  { %301 = dma.done.wait [#allocation3], 256  }
 0x1ad   :  { %302 = vsyncadd [#allocation3], 4294967040 }
 0x1ae   :  { %227 = vsyncpa [#allocation3], 1 }

</bundles_post_ra>
